<compile_context>
chip_gen: v7x
topology: tpu7x:2x2x1
jax: 0.10.0
libtpu: 0.0.40
codegen_flags: <defaults>
</compile_context>

<pallas_src>
import math

import jax
import jax.numpy as jnp
from jax.experimental import pallas as pl
from jax.experimental.pallas import tpu as pltpu

# --- model hyper-parameters (small, consistent with the module) -------------
S = 8            # sequence length
B = 2            # batch
D = 32           # d_model
H = 4            # num heads
DH = D // H      # head dim
FF = 64          # dim_feedforward
NUM_LAYERS = 2   # num_layers for selfFusionNet
EPS = 1e-5
N = B * S        # total tokens

# --- packed parameter slab layout (rows 8-aligned, 128 lanes wide) ----------
R_WQKV, R_BQKV = 0, 32          # (D,3D), (1,3D)
R_WO,   R_BO   = 40, 72         # (D,D),  (1,D)
R_W1,   R_B1   = 80, 112        # (D,FF), (1,FF)
R_W2,   R_B2   = 120, 184       # (FF,D), (1,D)
R_G1, R_BE1, R_G2, R_BE2 = 192, 200, 208, 216
SLAB_ROWS, SLAB_COLS = 224, 128


def pack_params(params):
    """One-time packing of the 12 param arrays into one lane-dense f32 slab."""
    (wqkv, bqkv, wo, bo, w1, b1, w2, b2, g1, be1, g2, be2) = params
    slab = jnp.zeros((SLAB_ROWS, SLAB_COLS), jnp.float32)
    for row, arr in ((R_WQKV, wqkv), (R_BQKV, bqkv), (R_WO, wo), (R_BO, bo),
                     (R_W1, w1), (R_B1, b1), (R_W2, w2), (R_B2, b2),
                     (R_G1, g1), (R_BE1, be1), (R_G2, g2), (R_BE2, be2)):
        r, c = arr.shape
        slab = slab.at[row:row + r, 0:c].set(arr.astype(jnp.float32))
    return slab


def make_self_fusion_kernel(num_layers):
    """Whole network (num_layers identical fusion layers) in one kernel call.

    x_ref:    (S, B, D)  input in the PyTorch MHA layout (relayout in-kernel)
    slab_ref: (224, 128) packed parameters
    o_ref:    (S, B, D)
    """

    def kernel(x_ref, slab_ref, o_ref):
        # ---- parameters: static slices of the packed slab (read once) ----
        wqkv = slab_ref[R_WQKV:R_WQKV + D, 0:3 * D]
        wo = slab_ref[R_WO:R_WO + D, 0:D]
        w1 = slab_ref[R_W1:R_W1 + D, 0:FF]
        w2 = slab_ref[R_W2:R_W2 + FF, 0:D]
        # biases / LN params: pre-broadcast ONCE (hoisted out of the layer loop)
        bqkv = jnp.broadcast_to(slab_ref[R_BQKV:R_BQKV + 1, 0:3 * D], (N, 3 * D))
        bo = jnp.broadcast_to(slab_ref[R_BO:R_BO + 1, 0:D], (N, D))
        b1 = jnp.broadcast_to(slab_ref[R_B1:R_B1 + 1, 0:FF], (N, FF))
        b2 = jnp.broadcast_to(slab_ref[R_B2:R_B2 + 1, 0:D], (N, D))
        g1 = jnp.broadcast_to(slab_ref[R_G1:R_G1 + 1, 0:D], (N, D))
        be1 = jnp.broadcast_to(slab_ref[R_BE1:R_BE1 + 1, 0:D], (N, D))
        g2 = jnp.broadcast_to(slab_ref[R_G2:R_G2 + 1, 0:D], (N, D))
        be2 = jnp.broadcast_to(slab_ref[R_BE2:R_BE2 + 1, 0:D], (N, D))

        scale = 1.0 / math.sqrt(DH)

        # ---- fold the (S,B,D) -> (B*S,D) batch-major relayout into the kernel
        xv = x_ref[...].astype(jnp.float32)                      # (S, B, D)
        x = jnp.concatenate([xv[:, b, :] for b in range(B)], axis=0)  # (B*S, D)

        def layer_norm(h, g, be):
            # two-moment form: both cross-lane reductions issue back-to-back
            mu = jnp.mean(h, axis=-1, keepdims=True)
            ex2 = jnp.mean(h * h, axis=-1, keepdims=True)
            var = ex2 - mu * mu
            return (h - mu) * jax.lax.rsqrt(var + EPS) * g + be

        def fusion_layer(x):                                     # x: (B*S, D)
            # ---- fused QKV projection (one matmul for all tokens) ----
            qkv = jnp.dot(x, wqkv, preferred_element_type=jnp.float32) + bqkv
            qkv3 = qkv.reshape(B, S, 3 * D)                      # (B, S, 3D)

            # ---- head-batched (H*B, S, DH) layout: ONE dot_general for the
            # scores and ONE for the context (instead of per-head einsums) ----
            def heads(base):
                return jnp.concatenate(
                    [qkv3[:, :, base + h * DH: base + (h + 1) * DH]
                     for h in range(H)], axis=0)                 # (H*B, S, DH)

            qh = heads(0)
            kh = heads(D)
            vh = heads(2 * D)

            s = jnp.einsum('bqd,bkd->bqk', qh, kh,
                           preferred_element_type=jnp.float32) * scale  # (H*B,S,S)
            s = s - jnp.max(s, axis=-1, keepdims=True)
            p = jnp.exp(s)
            p = p / jnp.sum(p, axis=-1, keepdims=True)           # exact divide
            ctx = jnp.einsum('bqk,bkd->bqd', p, vh,
                             preferred_element_type=jnp.float32)        # (H*B,S,DH)

            # regroup heads back onto lanes -> single K=D output projection
            ctx_full = jnp.concatenate(
                [ctx[h * B:(h + 1) * B] for h in range(H)], axis=-1)    # (B,S,D)
            attn = jnp.dot(ctx_full.reshape(N, D), wo,
                           preferred_element_type=jnp.float32) + bo

            # ---- residual + LayerNorm 1 ----
            h1 = layer_norm(x + attn, g1, be1)

            # ---- feed-forward ----
            f = jnp.dot(h1, w1, preferred_element_type=jnp.float32) + b1
            f = jnp.maximum(f, 0.0)
            f = jnp.dot(f, w2, preferred_element_type=jnp.float32) + b2

            # ---- residual + LayerNorm 2 ----
            return layer_norm(h1 + f, g2, be2)

        # deepcopy in _get_clones => identical params; static unrolled loop
        for _ in range(num_layers):
            x = fusion_layer(x)

        # ---- write back in the caller's (S, B, D) layout ----
        out = jnp.stack([x[b * S:(b + 1) * S, :] for b in range(B)], axis=1)
        o_ref[...] = out.astype(o_ref.dtype)

    return kernel


def self_fusion_net(src1_sbd, param_slab, num_layers=NUM_LAYERS):
    """selfFusionNet.forward.  src1_sbd: (S, B, D); param_slab from pack_params."""
    vmem = pl.BlockSpec(memory_space=pltpu.MemorySpace.VMEM)
    return pl.pallas_call(
        make_self_fusion_kernel(num_layers),
        out_shape=jax.ShapeDtypeStruct((S, B, D), src1_sbd.dtype),
        in_specs=[vmem, vmem],            # full arrays, single invocation, no grid
        out_specs=vmem,
    )(src1_sbd, param_slab)


# ---- pure-JAX reference (sanity check) --------------------------------------
def fusion_layer_ref(x_bsd, params):
    (wqkv, bqkv, wo, bo, w1, b1, w2, b2, g1, be1, g2, be2) = params
    x = x_bsd.astype(jnp.float32)
    qkv = x @ wqkv + bqkv
    q, k, v = qkv[..., :D], qkv[..., D:2 * D], qkv[..., 2 * D:]
    qh = q.reshape(B, S, H, DH)
    kh = k.reshape(B, S, H, DH)
    vh = v.reshape(B, S, H, DH)
    s = jnp.einsum('bshd,bthd->bhst', qh, kh) / math.sqrt(DH)
    p = jax.nn.softmax(s, axis=-1)
    ctx = jnp.einsum('bhst,bthd->bshd', p, vh).reshape(B, S, D)
    attn = ctx @ wo + bo
    h1 = x + attn
    h1 = (h1 - h1.mean(-1, keepdims=True)) * jax.lax.rsqrt(
        h1.var(-1, keepdims=True) + EPS) * g1 + be1
    f = jnp.maximum(h1 @ w1 + b1, 0.0) @ w2 + b2
    h2 = h1 + f
    h2 = (h2 - h2.mean(-1, keepdims=True)) * jax.lax.rsqrt(
        h2.var(-1, keepdims=True) + EPS) * g2 + be2
    return h2


def make_params(key):
    ks = jax.random.split(key, 8)
    scale = 0.05
    wqkv = scale * jax.random.normal(ks[0], (D, 3 * D), jnp.float32)
    bqkv = scale * jax.random.normal(ks[1], (1, 3 * D), jnp.float32)
    wo = scale * jax.random.normal(ks[2], (D, D), jnp.float32)
    bo = scale * jax.random.normal(ks[3], (1, D), jnp.float32)
    w1 = scale * jax.random.normal(ks[4], (D, FF), jnp.float32)
    b1 = scale * jax.random.normal(ks[5], (1, FF), jnp.float32)
    w2 = scale * jax.random.normal(ks[6], (FF, D), jnp.float32)
    b2 = scale * jax.random.normal(ks[7], (1, D), jnp.float32)
    g1 = jnp.ones((1, D), jnp.float32)
    be1 = jnp.zeros((1, D), jnp.float32)
    g2 = jnp.ones((1, D), jnp.float32)
    be2 = jnp.zeros((1, D), jnp.float32)
    return (wqkv, bqkv, wo, bo, w1, b1, w2, b2, g1, be1, g2, be2)


if __name__ == "__main__":
    key = jax.random.PRNGKey(0)
    k_x, k_p = jax.random.split(key)

    # src1 in PyTorch MultiheadAttention layout (S, B, D)
    src1 = jax.random.normal(k_x, (S, B, D), jnp.float32)
    params = make_params(k_p)
    slab = pack_params(params)          # one-time, lane-dense parameter packing

    out = self_fusion_net(src1, slab, num_layers=NUM_LAYERS)
    out = jax.block_until_ready(out)
    assert out.shape == (S, B, D)

    # sanity check against a pure-JAX reference of the same stacked layers
    ref = jnp.transpose(src1, (1, 0, 2))
    for _ in range(NUM_LAYERS):
        ref = fusion_layer_ref(ref, params)
    ref = jnp.transpose(ref, (1, 0, 2))
    assert jnp.allclose(out, ref, atol=1e-3, rtol=1e-3), "mismatch vs reference"

    print("KERNEL_OK")
</pallas_src>

<mosaic_0001>
module attributes {stable_mosaic.version = 11 : i64} {
  func.func @kernel(%arg0: memref<8x2x32xf32, #tpu.memory_space<vmem>>, %arg1: memref<224x128xf32, #tpu.memory_space<vmem>>, %arg2: memref<8x2x32xf32, #tpu.memory_space<vmem>>) attributes {dimension_semantics = [], scalar_prefetch = 0 : i64, scratch_operands = 0 : i64, tpu.core_type = #tpu.core_type<tc>} {
    %c0 = arith.constant 0 : index
    %c0_0 = arith.constant 0 : index
    %0 = vector.load %arg1[%c0, %c0_0] : memref<224x128xf32, #tpu.memory_space<vmem>>, vector<32x96xf32>
    %c40 = arith.constant 40 : index
    %c0_1 = arith.constant 0 : index
    %1 = vector.load %arg1[%c40, %c0_1] : memref<224x128xf32, #tpu.memory_space<vmem>>, vector<32x32xf32>
    %c80 = arith.constant 80 : index
    %c0_2 = arith.constant 0 : index
    %2 = vector.load %arg1[%c80, %c0_2] : memref<224x128xf32, #tpu.memory_space<vmem>>, vector<32x64xf32>
    %c120 = arith.constant 120 : index
    %c0_3 = arith.constant 0 : index
    %3 = vector.load %arg1[%c120, %c0_3] : memref<224x128xf32, #tpu.memory_space<vmem>>, vector<64x32xf32>
    %c32 = arith.constant 32 : index
    %c0_4 = arith.constant 0 : index
    %4 = vector.load %arg1[%c32, %c0_4] : memref<224x128xf32, #tpu.memory_space<vmem>>, vector<1x96xf32>
    %5 = vector.shape_cast %4 : vector<1x96xf32> to vector<1x96xf32>
    %6 = vector.broadcast %5 : vector<1x96xf32> to vector<16x96xf32>
    %c72 = arith.constant 72 : index
    %c0_5 = arith.constant 0 : index
    %7 = vector.load %arg1[%c72, %c0_5] : memref<224x128xf32, #tpu.memory_space<vmem>>, vector<1x32xf32>
    %8 = vector.shape_cast %7 : vector<1x32xf32> to vector<1x32xf32>
    %9 = vector.broadcast %8 : vector<1x32xf32> to vector<16x32xf32>
    %c112 = arith.constant 112 : index
    %c0_6 = arith.constant 0 : index
    %10 = vector.load %arg1[%c112, %c0_6] : memref<224x128xf32, #tpu.memory_space<vmem>>, vector<1x64xf32>
    %11 = vector.shape_cast %10 : vector<1x64xf32> to vector<1x64xf32>
    %12 = vector.broadcast %11 : vector<1x64xf32> to vector<16x64xf32>
    %c184 = arith.constant 184 : index
    %c0_7 = arith.constant 0 : index
    %13 = vector.load %arg1[%c184, %c0_7] : memref<224x128xf32, #tpu.memory_space<vmem>>, vector<1x32xf32>
    %14 = vector.shape_cast %13 : vector<1x32xf32> to vector<1x32xf32>
    %15 = vector.broadcast %14 : vector<1x32xf32> to vector<16x32xf32>
    %c192 = arith.constant 192 : index
    %c0_8 = arith.constant 0 : index
    %16 = vector.load %arg1[%c192, %c0_8] : memref<224x128xf32, #tpu.memory_space<vmem>>, vector<1x32xf32>
    %17 = vector.shape_cast %16 : vector<1x32xf32> to vector<1x32xf32>
    %18 = vector.broadcast %17 : vector<1x32xf32> to vector<16x32xf32>
    %c200 = arith.constant 200 : index
    %c0_9 = arith.constant 0 : index
    %19 = vector.load %arg1[%c200, %c0_9] : memref<224x128xf32, #tpu.memory_space<vmem>>, vector<1x32xf32>
    %20 = vector.shape_cast %19 : vector<1x32xf32> to vector<1x32xf32>
    %21 = vector.broadcast %20 : vector<1x32xf32> to vector<16x32xf32>
    %c208 = arith.constant 208 : index
    %c0_10 = arith.constant 0 : index
    %22 = vector.load %arg1[%c208, %c0_10] : memref<224x128xf32, #tpu.memory_space<vmem>>, vector<1x32xf32>
    %23 = vector.shape_cast %22 : vector<1x32xf32> to vector<1x32xf32>
    %24 = vector.broadcast %23 : vector<1x32xf32> to vector<16x32xf32>
    %c216 = arith.constant 216 : index
    %c0_11 = arith.constant 0 : index
    %25 = vector.load %arg1[%c216, %c0_11] : memref<224x128xf32, #tpu.memory_space<vmem>>, vector<1x32xf32>
    %26 = vector.shape_cast %25 : vector<1x32xf32> to vector<1x32xf32>
    %27 = vector.broadcast %26 : vector<1x32xf32> to vector<16x32xf32>
    %c0_12 = arith.constant 0 : index
    %c0_13 = arith.constant 0 : index
    %c0_14 = arith.constant 0 : index
    %28 = vector.load %arg0[%c0_12, %c0_13, %c0_14] : memref<8x2x32xf32, #tpu.memory_space<vmem>>, vector<8x2x32xf32>
    %29 = vector.extract_strided_slice %28 {offsets = [0, 0, 0], sizes = [8, 1, 32], strides = [1, 1, 1]} : vector<8x2x32xf32> to vector<8x1x32xf32>
    %30 = vector.shape_cast %29 : vector<8x1x32xf32> to vector<8x32xf32>
    %31 = vector.extract_strided_slice %28 {offsets = [0, 1, 0], sizes = [8, 1, 32], strides = [1, 1, 1]} : vector<8x2x32xf32> to vector<8x1x32xf32>
    %32 = vector.shape_cast %31 : vector<8x1x32xf32> to vector<8x32xf32>
    %33 = tpu.concatenate %30, %32 in 0 : vector<8x32xf32>, vector<8x32xf32> -> vector<16x32xf32>
    %cst = arith.constant dense<0.000000e+00> : vector<16x96xf32>
    %34 = tpu.matmul %33, %0, %cst {dimension_numbers = #tpu.dot_dimension_numbers<[1], [0], [0], [1], [0, 0, 1, 1], [], []>} : vector<16x32xf32>, vector<32x96xf32>, vector<16x96xf32> -> vector<16x96xf32>
    %35 = arith.addf %34, %6 : vector<16x96xf32>
    %36 = vector.shape_cast %35 : vector<16x96xf32> to vector<2x8x96xf32>
    %37 = vector.extract_strided_slice %36 {offsets = [0, 0, 0], sizes = [2, 8, 8], strides = [1, 1, 1]} : vector<2x8x96xf32> to vector<2x8x8xf32>
    %38 = vector.extract_strided_slice %36 {offsets = [0, 0, 8], sizes = [2, 8, 8], strides = [1, 1, 1]} : vector<2x8x96xf32> to vector<2x8x8xf32>
    %39 = vector.extract_strided_slice %36 {offsets = [0, 0, 16], sizes = [2, 8, 8], strides = [1, 1, 1]} : vector<2x8x96xf32> to vector<2x8x8xf32>
    %40 = vector.extract_strided_slice %36 {offsets = [0, 0, 24], sizes = [2, 8, 8], strides = [1, 1, 1]} : vector<2x8x96xf32> to vector<2x8x8xf32>
    %41 = tpu.concatenate %37, %38, %39, %40 in 0 : vector<2x8x8xf32>, vector<2x8x8xf32>, vector<2x8x8xf32>, vector<2x8x8xf32> -> vector<8x8x8xf32>
    %42 = vector.extract_strided_slice %36 {offsets = [0, 0, 32], sizes = [2, 8, 8], strides = [1, 1, 1]} : vector<2x8x96xf32> to vector<2x8x8xf32>
    %43 = vector.extract_strided_slice %36 {offsets = [0, 0, 40], sizes = [2, 8, 8], strides = [1, 1, 1]} : vector<2x8x96xf32> to vector<2x8x8xf32>
    %44 = vector.extract_strided_slice %36 {offsets = [0, 0, 48], sizes = [2, 8, 8], strides = [1, 1, 1]} : vector<2x8x96xf32> to vector<2x8x8xf32>
    %45 = vector.extract_strided_slice %36 {offsets = [0, 0, 56], sizes = [2, 8, 8], strides = [1, 1, 1]} : vector<2x8x96xf32> to vector<2x8x8xf32>
    %46 = tpu.concatenate %42, %43, %44, %45 in 0 : vector<2x8x8xf32>, vector<2x8x8xf32>, vector<2x8x8xf32>, vector<2x8x8xf32> -> vector<8x8x8xf32>
    %47 = vector.extract_strided_slice %36 {offsets = [0, 0, 64], sizes = [2, 8, 8], strides = [1, 1, 1]} : vector<2x8x96xf32> to vector<2x8x8xf32>
    %48 = vector.extract_strided_slice %36 {offsets = [0, 0, 72], sizes = [2, 8, 8], strides = [1, 1, 1]} : vector<2x8x96xf32> to vector<2x8x8xf32>
    %49 = vector.extract_strided_slice %36 {offsets = [0, 0, 80], sizes = [2, 8, 8], strides = [1, 1, 1]} : vector<2x8x96xf32> to vector<2x8x8xf32>
    %50 = vector.extract_strided_slice %36 {offsets = [0, 0, 88], sizes = [2, 8, 8], strides = [1, 1, 1]} : vector<2x8x96xf32> to vector<2x8x8xf32>
    %51 = tpu.concatenate %47, %48, %49, %50 in 0 : vector<2x8x8xf32>, vector<2x8x8xf32>, vector<2x8x8xf32>, vector<2x8x8xf32> -> vector<8x8x8xf32>
    "tpu.trace_start"() <{level = 10 : i32, message = "bqd,bkd->bqk"}> : () -> ()
    %cst_15 = arith.constant dense<0.000000e+00> : vector<8x8x8xf32>
    %52 = tpu.matmul %41, %46, %cst_15 {dimension_numbers = #tpu.dot_dimension_numbers<[2], [2], [1], [1], [0, 0, 0, 1, 1, 1], [0], [0]>} : vector<8x8x8xf32>, vector<8x8x8xf32>, vector<8x8x8xf32> -> vector<8x8x8xf32>
    "tpu.trace_stop"() : () -> ()
    %cst_16 = arith.constant 0.353553385 : f32
    %53 = vector.broadcast %cst_16 : f32 to vector<8x8x8xf32>
    %54 = arith.mulf %52, %53 : vector<8x8x8xf32>
    %cst_17 = arith.constant dense<0xFF800000> : vector<8x8xf32>
    %55 = vector.multi_reduction <maximumf>, %54, %cst_17 [2] : vector<8x8x8xf32> to vector<8x8xf32>
    %56 = vector.shape_cast %55 : vector<8x8xf32> to vector<8x8x1xf32>
    %57 = vector.broadcast %56 : vector<8x8x1xf32> to vector<8x8x8xf32>
    %58 = arith.subf %54, %57 : vector<8x8x8xf32>
    %59 = math.exp %58 : vector<8x8x8xf32>
    %cst_18 = arith.constant dense<0.000000e+00> : vector<8x8xf32>
    %60 = vector.multi_reduction <add>, %59, %cst_18 [2] : vector<8x8x8xf32> to vector<8x8xf32>
    %61 = vector.shape_cast %60 : vector<8x8xf32> to vector<8x8x1xf32>
    %62 = vector.broadcast %61 : vector<8x8x1xf32> to vector<8x8x8xf32>
    %63 = arith.divf %59, %62 : vector<8x8x8xf32>
    "tpu.trace_start"() <{level = 10 : i32, message = "bqk,bkd->bqd"}> : () -> ()
    %cst_19 = arith.constant dense<0.000000e+00> : vector<8x8x8xf32>
    %64 = tpu.matmul %63, %51, %cst_19 {dimension_numbers = #tpu.dot_dimension_numbers<[2], [1], [1], [2], [0, 0, 0, 1, 1, 2], [0], [0]>} : vector<8x8x8xf32>, vector<8x8x8xf32>, vector<8x8x8xf32> -> vector<8x8x8xf32>
    "tpu.trace_stop"() : () -> ()
    %65 = vector.extract_strided_slice %64 {offsets = [0, 0, 0], sizes = [2, 8, 8], strides = [1, 1, 1]} : vector<8x8x8xf32> to vector<2x8x8xf32>
    %66 = vector.extract_strided_slice %64 {offsets = [2, 0, 0], sizes = [2, 8, 8], strides = [1, 1, 1]} : vector<8x8x8xf32> to vector<2x8x8xf32>
    %67 = vector.extract_strided_slice %64 {offsets = [4, 0, 0], sizes = [2, 8, 8], strides = [1, 1, 1]} : vector<8x8x8xf32> to vector<2x8x8xf32>
    %68 = vector.extract_strided_slice %64 {offsets = [6, 0, 0], sizes = [2, 8, 8], strides = [1, 1, 1]} : vector<8x8x8xf32> to vector<2x8x8xf32>
    %69 = tpu.concatenate %65, %66, %67, %68 in 2 : vector<2x8x8xf32>, vector<2x8x8xf32>, vector<2x8x8xf32>, vector<2x8x8xf32> -> vector<2x8x32xf32>
    %70 = vector.shape_cast %69 : vector<2x8x32xf32> to vector<16x32xf32>
    %cst_20 = arith.constant dense<0.000000e+00> : vector<16x32xf32>
    %71 = tpu.matmul %70, %1, %cst_20 {dimension_numbers = #tpu.dot_dimension_numbers<[1], [0], [0], [1], [0, 0, 1, 1], [], []>} : vector<16x32xf32>, vector<32x32xf32>, vector<16x32xf32> -> vector<16x32xf32>
    %72 = arith.addf %71, %9 : vector<16x32xf32>
    %73 = arith.addf %33, %72 : vector<16x32xf32>
    %cst_21 = arith.constant dense<0.000000e+00> : vector<16xf32>
    %74 = vector.multi_reduction <add>, %73, %cst_21 [1] : vector<16x32xf32> to vector<16xf32>
    %75 = vector.shape_cast %74 : vector<16xf32> to vector<16x1xf32>
    %cst_22 = arith.constant 3.200000e+01 : f32
    %76 = vector.broadcast %cst_22 : f32 to vector<16x1xf32>
    %77 = arith.divf %75, %76 : vector<16x1xf32>
    %78 = arith.mulf %73, %73 : vector<16x32xf32>
    %cst_23 = arith.constant dense<0.000000e+00> : vector<16xf32>
    %79 = vector.multi_reduction <add>, %78, %cst_23 [1] : vector<16x32xf32> to vector<16xf32>
    %80 = vector.shape_cast %79 : vector<16xf32> to vector<16x1xf32>
    %cst_24 = arith.constant 3.200000e+01 : f32
    %81 = vector.broadcast %cst_24 : f32 to vector<16x1xf32>
    %82 = arith.divf %80, %81 : vector<16x1xf32>
    %83 = arith.mulf %77, %77 : vector<16x1xf32>
    %84 = arith.subf %82, %83 : vector<16x1xf32>
    %85 = vector.broadcast %77 : vector<16x1xf32> to vector<16x32xf32>
    %86 = arith.subf %73, %85 : vector<16x32xf32>
    %cst_25 = arith.constant 9.99999974E-6 : f32
    %87 = vector.broadcast %cst_25 : f32 to vector<16x1xf32>
    %88 = arith.addf %84, %87 : vector<16x1xf32>
    %89 = math.rsqrt %88 : vector<16x1xf32>
    %90 = vector.broadcast %89 : vector<16x1xf32> to vector<16x32xf32>
    %91 = arith.mulf %86, %90 : vector<16x32xf32>
    %92 = arith.mulf %91, %18 : vector<16x32xf32>
    %93 = arith.addf %92, %21 : vector<16x32xf32>
    %cst_26 = arith.constant dense<0.000000e+00> : vector<16x64xf32>
    %94 = tpu.matmul %93, %2, %cst_26 {dimension_numbers = #tpu.dot_dimension_numbers<[1], [0], [0], [1], [0, 0, 1, 1], [], []>} : vector<16x32xf32>, vector<32x64xf32>, vector<16x64xf32> -> vector<16x64xf32>
    %95 = arith.addf %94, %12 : vector<16x64xf32>
    %cst_27 = arith.constant 0.000000e+00 : f32
    %96 = vector.broadcast %cst_27 : f32 to vector<16x64xf32>
    %97 = arith.maximumf %95, %96 : vector<16x64xf32>
    %cst_28 = arith.constant dense<0.000000e+00> : vector<16x32xf32>
    %98 = tpu.matmul %97, %3, %cst_28 {dimension_numbers = #tpu.dot_dimension_numbers<[1], [0], [0], [1], [0, 0, 1, 1], [], []>} : vector<16x64xf32>, vector<64x32xf32>, vector<16x32xf32> -> vector<16x32xf32>
    %99 = arith.addf %98, %15 : vector<16x32xf32>
    %100 = arith.addf %93, %99 : vector<16x32xf32>
    %cst_29 = arith.constant dense<0.000000e+00> : vector<16xf32>
    %101 = vector.multi_reduction <add>, %100, %cst_29 [1] : vector<16x32xf32> to vector<16xf32>
    %102 = vector.shape_cast %101 : vector<16xf32> to vector<16x1xf32>
    %cst_30 = arith.constant 3.200000e+01 : f32
    %103 = vector.broadcast %cst_30 : f32 to vector<16x1xf32>
    %104 = arith.divf %102, %103 : vector<16x1xf32>
    %105 = arith.mulf %100, %100 : vector<16x32xf32>
    %cst_31 = arith.constant dense<0.000000e+00> : vector<16xf32>
    %106 = vector.multi_reduction <add>, %105, %cst_31 [1] : vector<16x32xf32> to vector<16xf32>
    %107 = vector.shape_cast %106 : vector<16xf32> to vector<16x1xf32>
    %cst_32 = arith.constant 3.200000e+01 : f32
    %108 = vector.broadcast %cst_32 : f32 to vector<16x1xf32>
    %109 = arith.divf %107, %108 : vector<16x1xf32>
    %110 = arith.mulf %104, %104 : vector<16x1xf32>
    %111 = arith.subf %109, %110 : vector<16x1xf32>
    %112 = vector.broadcast %104 : vector<16x1xf32> to vector<16x32xf32>
    %113 = arith.subf %100, %112 : vector<16x32xf32>
    %cst_33 = arith.constant 9.99999974E-6 : f32
    %114 = vector.broadcast %cst_33 : f32 to vector<16x1xf32>
    %115 = arith.addf %111, %114 : vector<16x1xf32>
    %116 = math.rsqrt %115 : vector<16x1xf32>
    %117 = vector.broadcast %116 : vector<16x1xf32> to vector<16x32xf32>
    %118 = arith.mulf %113, %117 : vector<16x32xf32>
    %119 = arith.mulf %118, %24 : vector<16x32xf32>
    %120 = arith.addf %119, %27 : vector<16x32xf32>
    %cst_34 = arith.constant dense<0.000000e+00> : vector<16x96xf32>
    %121 = tpu.matmul %120, %0, %cst_34 {dimension_numbers = #tpu.dot_dimension_numbers<[1], [0], [0], [1], [0, 0, 1, 1], [], []>} : vector<16x32xf32>, vector<32x96xf32>, vector<16x96xf32> -> vector<16x96xf32>
    %122 = arith.addf %121, %6 : vector<16x96xf32>
    %123 = vector.shape_cast %122 : vector<16x96xf32> to vector<2x8x96xf32>
    %124 = vector.extract_strided_slice %123 {offsets = [0, 0, 0], sizes = [2, 8, 8], strides = [1, 1, 1]} : vector<2x8x96xf32> to vector<2x8x8xf32>
    %125 = vector.extract_strided_slice %123 {offsets = [0, 0, 8], sizes = [2, 8, 8], strides = [1, 1, 1]} : vector<2x8x96xf32> to vector<2x8x8xf32>
    %126 = vector.extract_strided_slice %123 {offsets = [0, 0, 16], sizes = [2, 8, 8], strides = [1, 1, 1]} : vector<2x8x96xf32> to vector<2x8x8xf32>
    %127 = vector.extract_strided_slice %123 {offsets = [0, 0, 24], sizes = [2, 8, 8], strides = [1, 1, 1]} : vector<2x8x96xf32> to vector<2x8x8xf32>
    %128 = tpu.concatenate %124, %125, %126, %127 in 0 : vector<2x8x8xf32>, vector<2x8x8xf32>, vector<2x8x8xf32>, vector<2x8x8xf32> -> vector<8x8x8xf32>
    %129 = vector.extract_strided_slice %123 {offsets = [0, 0, 32], sizes = [2, 8, 8], strides = [1, 1, 1]} : vector<2x8x96xf32> to vector<2x8x8xf32>
    %130 = vector.extract_strided_slice %123 {offsets = [0, 0, 40], sizes = [2, 8, 8], strides = [1, 1, 1]} : vector<2x8x96xf32> to vector<2x8x8xf32>
    %131 = vector.extract_strided_slice %123 {offsets = [0, 0, 48], sizes = [2, 8, 8], strides = [1, 1, 1]} : vector<2x8x96xf32> to vector<2x8x8xf32>
    %132 = vector.extract_strided_slice %123 {offsets = [0, 0, 56], sizes = [2, 8, 8], strides = [1, 1, 1]} : vector<2x8x96xf32> to vector<2x8x8xf32>
    %133 = tpu.concatenate %129, %130, %131, %132 in 0 : vector<2x8x8xf32>, vector<2x8x8xf32>, vector<2x8x8xf32>, vector<2x8x8xf32> -> vector<8x8x8xf32>
    %134 = vector.extract_strided_slice %123 {offsets = [0, 0, 64], sizes = [2, 8, 8], strides = [1, 1, 1]} : vector<2x8x96xf32> to vector<2x8x8xf32>
    %135 = vector.extract_strided_slice %123 {offsets = [0, 0, 72], sizes = [2, 8, 8], strides = [1, 1, 1]} : vector<2x8x96xf32> to vector<2x8x8xf32>
    %136 = vector.extract_strided_slice %123 {offsets = [0, 0, 80], sizes = [2, 8, 8], strides = [1, 1, 1]} : vector<2x8x96xf32> to vector<2x8x8xf32>
    %137 = vector.extract_strided_slice %123 {offsets = [0, 0, 88], sizes = [2, 8, 8], strides = [1, 1, 1]} : vector<2x8x96xf32> to vector<2x8x8xf32>
    %138 = tpu.concatenate %134, %135, %136, %137 in 0 : vector<2x8x8xf32>, vector<2x8x8xf32>, vector<2x8x8xf32>, vector<2x8x8xf32> -> vector<8x8x8xf32>
    "tpu.trace_start"() <{level = 10 : i32, message = "bqd,bkd->bqk"}> : () -> ()
    %cst_35 = arith.constant dense<0.000000e+00> : vector<8x8x8xf32>
    %139 = tpu.matmul %128, %133, %cst_35 {dimension_numbers = #tpu.dot_dimension_numbers<[2], [2], [1], [1], [0, 0, 0, 1, 1, 1], [0], [0]>} : vector<8x8x8xf32>, vector<8x8x8xf32>, vector<8x8x8xf32> -> vector<8x8x8xf32>
    "tpu.trace_stop"() : () -> ()
    %cst_36 = arith.constant 0.353553385 : f32
    %140 = vector.broadcast %cst_36 : f32 to vector<8x8x8xf32>
    %141 = arith.mulf %139, %140 : vector<8x8x8xf32>
    %cst_37 = arith.constant dense<0xFF800000> : vector<8x8xf32>
    %142 = vector.multi_reduction <maximumf>, %141, %cst_37 [2] : vector<8x8x8xf32> to vector<8x8xf32>
    %143 = vector.shape_cast %142 : vector<8x8xf32> to vector<8x8x1xf32>
    %144 = vector.broadcast %143 : vector<8x8x1xf32> to vector<8x8x8xf32>
    %145 = arith.subf %141, %144 : vector<8x8x8xf32>
    %146 = math.exp %145 : vector<8x8x8xf32>
    %cst_38 = arith.constant dense<0.000000e+00> : vector<8x8xf32>
    %147 = vector.multi_reduction <add>, %146, %cst_38 [2] : vector<8x8x8xf32> to vector<8x8xf32>
    %148 = vector.shape_cast %147 : vector<8x8xf32> to vector<8x8x1xf32>
    %149 = vector.broadcast %148 : vector<8x8x1xf32> to vector<8x8x8xf32>
    %150 = arith.divf %146, %149 : vector<8x8x8xf32>
    "tpu.trace_start"() <{level = 10 : i32, message = "bqk,bkd->bqd"}> : () -> ()
    %cst_39 = arith.constant dense<0.000000e+00> : vector<8x8x8xf32>
    %151 = tpu.matmul %150, %138, %cst_39 {dimension_numbers = #tpu.dot_dimension_numbers<[2], [1], [1], [2], [0, 0, 0, 1, 1, 2], [0], [0]>} : vector<8x8x8xf32>, vector<8x8x8xf32>, vector<8x8x8xf32> -> vector<8x8x8xf32>
    "tpu.trace_stop"() : () -> ()
    %152 = vector.extract_strided_slice %151 {offsets = [0, 0, 0], sizes = [2, 8, 8], strides = [1, 1, 1]} : vector<8x8x8xf32> to vector<2x8x8xf32>
    %153 = vector.extract_strided_slice %151 {offsets = [2, 0, 0], sizes = [2, 8, 8], strides = [1, 1, 1]} : vector<8x8x8xf32> to vector<2x8x8xf32>
    %154 = vector.extract_strided_slice %151 {offsets = [4, 0, 0], sizes = [2, 8, 8], strides = [1, 1, 1]} : vector<8x8x8xf32> to vector<2x8x8xf32>
    %155 = vector.extract_strided_slice %151 {offsets = [6, 0, 0], sizes = [2, 8, 8], strides = [1, 1, 1]} : vector<8x8x8xf32> to vector<2x8x8xf32>
    %156 = tpu.concatenate %152, %153, %154, %155 in 2 : vector<2x8x8xf32>, vector<2x8x8xf32>, vector<2x8x8xf32>, vector<2x8x8xf32> -> vector<2x8x32xf32>
    %157 = vector.shape_cast %156 : vector<2x8x32xf32> to vector<16x32xf32>
    %cst_40 = arith.constant dense<0.000000e+00> : vector<16x32xf32>
    %158 = tpu.matmul %157, %1, %cst_40 {dimension_numbers = #tpu.dot_dimension_numbers<[1], [0], [0], [1], [0, 0, 1, 1], [], []>} : vector<16x32xf32>, vector<32x32xf32>, vector<16x32xf32> -> vector<16x32xf32>
    %159 = arith.addf %158, %9 : vector<16x32xf32>
    %160 = arith.addf %120, %159 : vector<16x32xf32>
    %cst_41 = arith.constant dense<0.000000e+00> : vector<16xf32>
    %161 = vector.multi_reduction <add>, %160, %cst_41 [1] : vector<16x32xf32> to vector<16xf32>
    %162 = vector.shape_cast %161 : vector<16xf32> to vector<16x1xf32>
    %cst_42 = arith.constant 3.200000e+01 : f32
    %163 = vector.broadcast %cst_42 : f32 to vector<16x1xf32>
    %164 = arith.divf %162, %163 : vector<16x1xf32>
    %165 = arith.mulf %160, %160 : vector<16x32xf32>
    %cst_43 = arith.constant dense<0.000000e+00> : vector<16xf32>
    %166 = vector.multi_reduction <add>, %165, %cst_43 [1] : vector<16x32xf32> to vector<16xf32>
    %167 = vector.shape_cast %166 : vector<16xf32> to vector<16x1xf32>
    %cst_44 = arith.constant 3.200000e+01 : f32
    %168 = vector.broadcast %cst_44 : f32 to vector<16x1xf32>
    %169 = arith.divf %167, %168 : vector<16x1xf32>
    %170 = arith.mulf %164, %164 : vector<16x1xf32>
    %171 = arith.subf %169, %170 : vector<16x1xf32>
    %172 = vector.broadcast %164 : vector<16x1xf32> to vector<16x32xf32>
    %173 = arith.subf %160, %172 : vector<16x32xf32>
    %cst_45 = arith.constant 9.99999974E-6 : f32
    %174 = vector.broadcast %cst_45 : f32 to vector<16x1xf32>
    %175 = arith.addf %171, %174 : vector<16x1xf32>
    %176 = math.rsqrt %175 : vector<16x1xf32>
    %177 = vector.broadcast %176 : vector<16x1xf32> to vector<16x32xf32>
    %178 = arith.mulf %173, %177 : vector<16x32xf32>
    %179 = arith.mulf %178, %18 : vector<16x32xf32>
    %180 = arith.addf %179, %21 : vector<16x32xf32>
    %cst_46 = arith.constant dense<0.000000e+00> : vector<16x64xf32>
    %181 = tpu.matmul %180, %2, %cst_46 {dimension_numbers = #tpu.dot_dimension_numbers<[1], [0], [0], [1], [0, 0, 1, 1], [], []>} : vector<16x32xf32>, vector<32x64xf32>, vector<16x64xf32> -> vector<16x64xf32>
    %182 = arith.addf %181, %12 : vector<16x64xf32>
    %cst_47 = arith.constant 0.000000e+00 : f32
    %183 = vector.broadcast %cst_47 : f32 to vector<16x64xf32>
    %184 = arith.maximumf %182, %183 : vector<16x64xf32>
    %cst_48 = arith.constant dense<0.000000e+00> : vector<16x32xf32>
    %185 = tpu.matmul %184, %3, %cst_48 {dimension_numbers = #tpu.dot_dimension_numbers<[1], [0], [0], [1], [0, 0, 1, 1], [], []>} : vector<16x64xf32>, vector<64x32xf32>, vector<16x32xf32> -> vector<16x32xf32>
    %186 = arith.addf %185, %15 : vector<16x32xf32>
    %187 = arith.addf %180, %186 : vector<16x32xf32>
    %cst_49 = arith.constant dense<0.000000e+00> : vector<16xf32>
    %188 = vector.multi_reduction <add>, %187, %cst_49 [1] : vector<16x32xf32> to vector<16xf32>
    %189 = vector.shape_cast %188 : vector<16xf32> to vector<16x1xf32>
    %cst_50 = arith.constant 3.200000e+01 : f32
    %190 = vector.broadcast %cst_50 : f32 to vector<16x1xf32>
    %191 = arith.divf %189, %190 : vector<16x1xf32>
    %192 = arith.mulf %187, %187 : vector<16x32xf32>
    %cst_51 = arith.constant dense<0.000000e+00> : vector<16xf32>
    %193 = vector.multi_reduction <add>, %192, %cst_51 [1] : vector<16x32xf32> to vector<16xf32>
    %194 = vector.shape_cast %193 : vector<16xf32> to vector<16x1xf32>
    %cst_52 = arith.constant 3.200000e+01 : f32
    %195 = vector.broadcast %cst_52 : f32 to vector<16x1xf32>
    %196 = arith.divf %194, %195 : vector<16x1xf32>
    %197 = arith.mulf %191, %191 : vector<16x1xf32>
    %198 = arith.subf %196, %197 : vector<16x1xf32>
    %199 = vector.broadcast %191 : vector<16x1xf32> to vector<16x32xf32>
    %200 = arith.subf %187, %199 : vector<16x32xf32>
    %cst_53 = arith.constant 9.99999974E-6 : f32
    %201 = vector.broadcast %cst_53 : f32 to vector<16x1xf32>
    %202 = arith.addf %198, %201 : vector<16x1xf32>
    %203 = math.rsqrt %202 : vector<16x1xf32>
    %204 = vector.broadcast %203 : vector<16x1xf32> to vector<16x32xf32>
    %205 = arith.mulf %200, %204 : vector<16x32xf32>
    %206 = arith.mulf %205, %24 : vector<16x32xf32>
    %207 = arith.addf %206, %27 : vector<16x32xf32>
    %208 = vector.extract_strided_slice %207 {offsets = [0, 0], sizes = [8, 32], strides = [1, 1]} : vector<16x32xf32> to vector<8x32xf32>
    %209 = vector.extract_strided_slice %207 {offsets = [8, 0], sizes = [8, 32], strides = [1, 1]} : vector<16x32xf32> to vector<8x32xf32>
    %210 = vector.shape_cast %208 : vector<8x32xf32> to vector<8x1x32xf32>
    %211 = vector.shape_cast %209 : vector<8x32xf32> to vector<8x1x32xf32>
    %212 = tpu.concatenate %210, %211 in 1 : vector<8x1x32xf32>, vector<8x1x32xf32> -> vector<8x2x32xf32>
    %c0_54 = arith.constant 0 : index
    %c0_55 = arith.constant 0 : index
    %c0_56 = arith.constant 0 : index
    %213 = vector.load %arg2[%c0_54, %c0_55, %c0_56] : memref<8x2x32xf32, #tpu.memory_space<vmem>>, vector<8x2x32xf32>
    tpu.vector_store %arg2[%c0_54, %c0_55, %c0_56], %212 {strides = array<i32>} : memref<8x2x32xf32, #tpu.memory_space<vmem>>, vector<8x2x32xf32>,
    return
  }
}

</mosaic_0001>

<bundles_post_ra>
// kernel: tpu_custom_call.1
= control target key start
LH: loop header
LB: loop body
LE: loop exit
PB: predicated region body
PF: predicated region fallthrough
CT: control target
= control target key end

     0   :  { %7 = vsyncpa [#allocation3], 0  ;;  %s5179_s0 = inlined_call_operand.hbm [shape: f32[8,2,32], index: 0, kind: input, shape index: {}]   ;;  %s5180_s1 = inlined_call_operand.hbm [shape: f32[224,128], index: 1, kind: input, shape index: {}]   ;;  %s5181_s2 = inlined_call_operand.hbm [shape: f32[8,2,32], index: 2, kind: output, shape index: {}]  }
   0x1   :  { %8 = vsyncpa [#allocation6], 0 }
   0x2   :  { %9 = vsyncpa [#allocation4], 0  ;;  %s4554_s9 = smov [#allocation2]   ;;  %s4482_s13 = scalar_lea.hbm %s5179_s0, 256 }
   0x3   :  { %s15_s10 = sshll.u32 %s4554_s9, 4  ;;  %p4483_p0 = scmp.ne.s32.totalorder %s5179_s0, %s4482_s13  ;;  %s16_s10 = int_to_ptr.vmem [resolvable:$true] %s15_s10 }
   0x4   :  { %p4486_p1 = scmp.lt.u32.totalorder %s4482_s13, %s5179_s0 }
   0x6   :  { %p4488_p2 = pnand %p4486_p1, %p4483_p0 }
   0x8   :  { %4491 = shalt.err (!%p4488_p2)
}
   0x9   :  { %s4492_s18 = scalar_lea.vmem %s16_s10, 256  ;;  %p4497_p4 = scmp.lt.s32.totalorder %s16_s10, %s16_s10 }
   0xa   :  { %p4493_p3 = scmp.ne.s32.totalorder %s16_s10, %s4492_s18  ;;  %p4498_p5 = scmp.lt.s32.totalorder %s4492_s18, %s4492_s18 }
   0xc   :  { %p4499_p6 = por %p4498_p5, %p4497_p4 }
   0xe   :  { %p4500_p7 = pnand %p4499_p6, %p4493_p3 }
  0x10   :  { %4503 = shalt.err (!%p4500_p7)
}
  0x11   :  { %s4555_s19 = smov 32   ;;  %s4556_s20 = smov 2  }
  0x12   :  { %21 = dma.hbm_to_vmem [thread:$0]  %s5179_s0, 256, %s16_s10, [#allocation3], %s4555_s19, %s4555_s19, %s4556_s20  }
  0x13   :  { %s4557_s23 = smov [#allocation5]   ;;  %s4504_s27 = scalar_lea.hbm %s5180_s1, 3584 }
  0x14   :  { %s27_s24 = sshll.u32 %s4557_s23, 4  ;;  %p4505_p8 = scmp.ne.s32.totalorder %s5180_s1, %s4504_s27  ;;  %s28_s24 = int_to_ptr.vmem [resolvable:$true] %s27_s24 }
  0x15   :  { %p4508_p9 = scmp.lt.u32.totalorder %s4504_s27, %s5180_s1 }
  0x17   :  { %p4510_p10 = pnand %p4508_p9, %p4505_p8 }
  0x19   :  { %4513 = shalt.err (!%p4510_p10)
}
  0x1a   :  { %s4514_s4 = scalar_lea.vmem %s28_s24, 3584  ;;  %p4519_p12 = scmp.lt.s32.totalorder %s28_s24, %s28_s24 }
  0x1b   :  { %p4515_p11 = scmp.ne.s32.totalorder %s28_s24, %s4514_s4  ;;  %p4520_p13 = scmp.lt.s32.totalorder %s4514_s4, %s4514_s4 }
  0x1d   :  { %p4521_p0 = por %p4520_p13, %p4519_p12 }
  0x1f   :  { %p4522_p1 = pnand %p4521_p0, %p4515_p11 }
  0x21   :  { %4525 = shalt.err (!%p4522_p1)
}
  0x22   :  { %s4558_s0 = smov 128   ;;  %s4559_s5 = smov 8  }
  0x23   :  { %33 = dma.hbm_to_vmem [thread:$0]  %s5180_s1, 3584, %s28_s24, [#allocation6], %s4558_s0, %s4558_s0, %s4559_s5  }
  0x24   :  { %4548 = dma.done.wait [#allocation3], 256  }
  0x25   :  { %4549 = vsyncadd [#allocation3], 4294967040 }
  0x26   :  { %4550 = dma.done.wait [#allocation6], 3584  }
  0x27   :  { %4551 = vsyncadd [#allocation6], 4294963712  ;;  %v40_v0 = vld [vmem:[#allocation5] sm:$0xff]  ;;  %v41_v1 = vld [vmem:[#allocation5 + $0x8] sm:$0xff]  ;;  %vm117_vm0 = vcmask 1041409   ;;  %vm120_vm1 = vcmask 1042434  }
  0x28   :  { %v42_v2 = vld [vmem:[#allocation5 + $0x10] sm:$0xff]  ;;  %v4614_v3 = vpack.c.bf16 %v41_v1, %v40_v0  ;;  %v43_v4 = vld [vmem:[#allocation5 + $0x18] sm:$0xff]  ;;  %vm123_vm2 = vcmask 1043459   ;;  %vm126_vm3 = vcmask 1044484   ;;  %vm129_vm4 = vcmask 1045509   ;;  %s4561_s1 = smov 112  }
  0x29   :  { %v100_v5 = vld [vmem:[#allocation2] sm:$0x3]  ;;  %v101_v6 = vld [vmem:[#allocation2 + $0x2] sm:$0x3]  ;;  %v4616_v7 = vpack.c.bf16 %v43_v4, %v42_v2  ;;  %v102_v8 = vld [vmem:[#allocation2 + $0x4] sm:$0x3] }
  0x2a   :  { %v103_v9 = vld [vmem:[#allocation2 + $0x6] sm:$0x3]  ;;  %v104_v10 = vld [vmem:[#allocation2 + $0x8] sm:$0x3]  ;;  %4306 = vmatprep.subr.bf16.mxu1 %v4614_v3  ;;  %v105_v11 = vld [vmem:[#allocation2 + $0xa] sm:$0x3] }
  0x2b   :  { %4308 = vmatpush3.bf16.msra.mxu1 %v4614_v3  ;;  %v106_v12 = vld [vmem:[#allocation2 + $0xc] sm:$0x3]  ;;  %v116_v13 = vrot.slane %v101_v6, 7  ;;  %v119_v14 = vrot.slane %v102_v8, 6  ;;  %v122_v15 = vrot.slane %v103_v9, 5  ;;  %v125_v17 = vrot.slane %v104_v10, 4 }
  0x2c   :  { %4310 = vmatprep.subr.bf16.mxu1 %v4616_v7  ;;  %v107_v16 = vld [vmem:[#allocation2 + $0xe] sm:$0x3]  ;;  %v138_v18 = vrot.slane %v100_v5, 1  ;;  %v128_v20 = vrot.slane %v105_v11, 3  ;;  %v140_v21 = vrot.slane %v102_v8, 7  ;;  %v142_v22 = vrot.slane %v103_v9, 6 }
  0x2d   :  { %v118_v19 = vsel %vm117_vm0, %v116_v13, %v100_v5  ;;  %v131_v24 = vrot.slane %v106_v12, 2  ;;  %vm132_vm5 = vcmask 1046534   ;;  %v144_v25 = vrot.slane %v104_v10, 5  ;;  %v4642_v42 = vld [vmem:[#allocation5 + $0x20] ss:$0 sm:$0xff]  ;;  %s4562_s8 = smov 120  }
  0x2e   :  { %v121_v23 = vsel %vm120_vm1, %v119_v14, %v118_v19  ;;  %v134_v27 = vrot.slane %v107_v16, 1  ;;  %v146_v28 = vrot.slane %v105_v11, 4  ;;  %v139_v29 = vsel %vm117_vm0, %v101_v6, %v138_v18  ;;  %s4564_s9 = smov 104   ;;  %s4565_s10 = smov 96  }
  0x2f   :  { %4312 = vmatpush3.bf16.msra.mxu1 %v4616_v7  ;;  %v124_v26 = vsel %vm123_vm2, %v122_v15, %v121_v23  ;;  %vm135_vm6 = vcmask 1047559   ;;  %v148_v31 = vrot.slane %v106_v12, 3  ;;  %v141_v32 = vsel %vm120_vm1, %v140_v21, %v139_v29  ;;  %s4566_s11 = smov 64   ;;  %s4567_s12 = smov 16  }
  0x30   :  { %v127_v30 = vsel %vm126_vm3, %v125_v17, %v124_v26  ;;  %v150_v34 = vrot.slane %v107_v16, 2  ;;  %vm153_vm7 = vcmask 261120   ;;  %v143_v35 = vsel %vm123_vm2, %v142_v22, %v141_v32  ;;  %s4568_s13 = smov 24   ;;  %s4570_s14 = smov [#allocation7]  }
  0x31   :  { %v130_v33 = vsel %vm129_vm4, %v128_v20, %v127_v30  ;;  %v145_v37 = vsel %vm126_vm3, %v144_v25, %v143_v35  ;;  %v4560_v44 = vmov 0.0   ;;  %vm4563_vm8 = vmmov 0   ;;  %s3836_s15 = sshll.u32 %s4570_s14, 4  ;;  %s3837_s15 = int_to_ptr.vmem [resolvable:$true] %s3836_s15 }
  0x32   :  { %v133_v36 = vsel %vm132_vm5, %v131_v24, %v130_v33  ;;  %v147_v39 = vsel %vm129_vm4, %v146_v28, %v145_v37  ;;  %4052 = vmatprep.subr.mxu1 %v4560_v44  ;;  %4062 = vmatprep.subr.mxu0 %v4560_v44  ;;  %vm249_vm9 = vcmask 64512   ;;  %vm1586_vm10 = vcmask 130048   ;;  %s4526_s16 = scalar_lea.vmem %s3837_s15, 256  ;;  %p4531_p3 = scmp.lt.s32.totalorder %s3837_s15, %s3837_s15 }
  0x33   :  { %v4632_v38 = vsel %vm135_vm6, %v134_v27, %v133_v36  ;;  %v149_v40 = vsel %vm132_vm5, %v148_v31, %v147_v39  ;;  %4064 = vmatprep.mubr.msk.f32.mxu0 %vm4563_vm8, %v4560_v44  ;;  %vm1589_vm11 = vcmask 195584   ;;  %vm1793_vm12 = vcmask 523264   ;;  %p4527_p2 = scmp.ne.s32.totalorder %s3837_s15, %s4526_s16  ;;  %p4532_p4 = scmp.lt.s32.totalorder %s4526_s16, %s4526_s16 }
  0x34   :  { %4049 = vmatprep.mubr.msk.f32.mxu1 %vm153_vm7, %v4632_v38  ;;  %v4638_v41 = vsel %vm135_vm6, %v150_v34, %v149_v40  ;;  %vm3813_vm13 = vcmask 1040384   ;;  %vm3822_vm14 = vcmask 254976  }
  0x35   :  { %4050 = vmatmul.mubr.msk.f32.vlgmr.msra.gmra.mrb[0].mxu1 %vm153_vm7, %v4638_v41  ;;  %p4533_p5 = por %p4532_p4, %p4531_p3 }
  0x36   :  { %4054 = vmatprep.mubr.msk.f32.mxu1 %vm4563_vm8, %v4560_v44 }
  0x37   :  { %p4534_p6 = pnand %p4533_p5, %p4527_p2 }
 0x108   :  { %v4051_v43 = vpop.f32.mrb[0].mxu1 }
 0x109   :  { %v224_v45 = vpop.f32.mrb[1].mxu1  ;;  %v4658_v47 = vadd.f32 %v4051_v43, %v4642_v42 }
 0x10a   :  { %v4647_v46 = vadd.f32 %v4642_v42, %v224_v45 }
 0x10c   :  { %239 = vrot.lane.b32.xlu1 %v4647_v46, %s4561_s1  ;;  %235 = vrot.lane.b32.xlu0 %v4647_v46, %s4562_s8 }
 0x110   :  { %241 = vrot.lane.b32.xlu1 %v4658_v47, %s4561_s1  ;;  %237 = vrot.lane.b32.xlu0 %v4658_v47, %s4562_s8 }
 0x114   :  { %245 = vrot.lane.b32.xlu1 %v4658_v47, %s4564_s9  ;;  %243 = vrot.lane.b32.xlu0 %v4647_v46, %s4564_s9 }
 0x118   :  { %324 = vrot.lane.b32.xlu1 %v4658_v47, %s4565_s10  ;;  %247 = vrot.lane.b32.xlu0 %v4647_v46, %s4565_s10 }
 0x17e   :  { %v4672_v48 = vpop.permute.xlu1 %239  ;;  %v4674_v49 = vpop.permute.xlu0 %235 }
 0x17f   :  { %400 = vrot.lane.b32.xlu0 %v4674_v49, %s4565_s10 }
 0x182   :  { %v4678_v50 = vpop.permute.xlu1 %241  ;;  %v4680_v51 = vpop.permute.xlu0 %237 }
 0x183   :  { %552 = vrot.lane.b32.xlu0 %v4672_v48, %s4565_s10  ;;  %476 = vrot.lane.b32.xlu1 %v4680_v51, %s4565_s10 }
 0x186   :  { %v4686_v52 = vpop.permute.xlu0 %243  ;;  %v4692_v53 = vpop.permute.xlu1 %245 }
 0x187   :  { %628 = vrot.lane.b32.xlu1 %v4678_v50, %s4565_s10  ;;  %704 = vrot.lane.b32.xlu0 %v4686_v52, %s4565_s10 }
 0x18a   :  { %v248_v54 = vpop.permute.xlu0 %247  ;;  %v325_v55 = vpop.permute.xlu1 %324 }
 0x18b   :  { %780 = vrot.lane.b32.xlu1 %v4692_v53, %s4565_s10  ;;  %4053 = vmatpush3.xpose.msk.msra.mxu1 %vm249_vm9, %v248_v54 }
 0x18c   :  { %4057 = vmatprep.subr.mxu1 %v4560_v44 }
 0x18e   :  { %4055 = vmatmul.mubr.msk.f32.vlgmr.msra.gmra.mrb[2].mxu1 %vm249_vm9, %v4647_v46 }
 0x18f   :  { %4058 = vmatpush3.xpose.msk.msra.mxu1 %vm249_vm9, %v325_v55  ;;  %4059 = vmatprep.mubr.msk.f32.mxu1 %vm4563_vm8, %v4560_v44 }
 0x190   :  { %4067 = vmatprep.subr.mxu1 %v4560_v44 }
 0x192   :  { %4060 = vmatmul.mubr.msk.f32.vlgmr.msra.gmra.mrb[4].mxu1 %vm249_vm9, %v4658_v47 }
 0x193   :  { %4069 = vmatprep.mubr.msk.f32.mxu1 %vm4563_vm8, %v4560_v44 }
 0x1f1   :  { %v401_v56 = vpop.permute.xlu0 %400 }
 0x1f2   :  { %4063 = vmatpush3.xpose.msk.msra.mxu0 %vm249_vm9, %v401_v56 }
 0x1f3   :  { %4072 = vmatprep.subr.mxu0 %v4560_v44 }
 0x1f5   :  { %v477_v57 = vpop.permute.xlu1 %476  ;;  %4065 = vmatmul.mubr.msk.f32.vlgmr.msra.gmra.mrb[0].mxu0 %vm249_vm9, %v4674_v49  ;;  %v553_v58 = vpop.permute.xlu0 %552 }
 0x1f6   :  { %4068 = vmatpush3.xpose.msk.msra.mxu1 %vm249_vm9, %v477_v57  ;;  %4073 = vmatpush3.xpose.msk.msra.mxu0 %vm249_vm9, %v553_v58 }
 0x1f7   :  { %4074 = vmatprep.mubr.msk.f32.mxu0 %vm4563_vm8, %v4560_v44  ;;  %4077 = vmatprep.subr.mxu1 %v4560_v44 }
 0x1f8   :  { %4082 = vmatprep.subr.mxu0 %v4560_v44 }
 0x1f9   :  { %v629_v59 = vpop.permute.xlu1 %628  ;;  %4070 = vmatmul.mubr.msk.f32.vlgmr.msra.gmra.mrb[6].mxu1 %vm249_vm9, %v4680_v51  ;;  %4075 = vmatmul.mubr.msk.f32.vlgmr.msra.gmra.mrb[2].mxu0 %vm249_vm9, %v4672_v48  ;;  %v705_v60 = vpop.permute.xlu0 %704 }
 0x1fa   :  { %4078 = vmatpush3.xpose.msk.msra.mxu1 %vm249_vm9, %v629_v59  ;;  %4083 = vmatpush3.xpose.msk.msra.mxu0 %vm249_vm9, %v705_v60 }
 0x1fb   :  { %4079 = vmatprep.mubr.msk.f32.mxu1 %vm4563_vm8, %v4560_v44  ;;  %4084 = vmatprep.mubr.msk.f32.mxu0 %vm4563_vm8, %v4560_v44 }
 0x1fc   :  { %4087 = vmatprep.subr.mxu1 %v4560_v44  ;;  %4092 = vmatprep.subr.mxu0 %v4560_v44 }
 0x1fd   :  { %v781_v61 = vpop.permute.xlu1 %780  ;;  %4080 = vmatmul.mubr.msk.f32.vlgmr.msra.gmra.mrb[8].mxu1 %vm249_vm9, %v4678_v50  ;;  %4085 = vmatmul.mubr.msk.f32.vlgmr.msra.gmra.mrb[4].mxu0 %vm249_vm9, %v4686_v52 }
 0x1fe   :  { %4088 = vmatpush3.xpose.msk.msra.mxu1 %vm249_vm9, %v781_v61  ;;  %4089 = vmatprep.mubr.msk.f32.mxu1 %vm4563_vm8, %v4560_v44 }
 0x1ff   :  { %4097 = vmatprep.subr.mxu1 %v4560_v44  ;;  %4094 = vmatprep.mubr.msk.f32.mxu0 %vm4563_vm8, %v4560_v44 }
 0x201   :  { %4090 = vmatmul.mubr.msk.f32.vlgmr.msra.gmra.mrb[10].mxu1 %vm249_vm9, %v4692_v53 }
 0x202   :  { %4099 = vmatprep.mubr.msk.f32.mxu1 %vm4563_vm8, %v4560_v44 }
 0x261   :  { %v320_v62 = vpop.f32.mrb[2].mxu1 }
 0x262   :  { %v856_v63 = vmul.f32 0.35355338, %v320_v62  ;;  %v4056_v0 = vpop.f32.mrb[3].mxu1 }
 0x264   :  { %v864_v1 = vsel %vm249_vm9, %v856_v63, -inf }
 0x265   :  { %865 = vmax.xlane.f32.xlu0 %v864_v1  ;;  %v396_v2 = vpop.f32.mrb[4].mxu1 }
 0x266   :  { %v857_v4 = vmul.f32 0.35355338, %v396_v2  ;;  %v4061_v5 = vpop.f32.mrb[5].mxu1 }
 0x268   :  { %v867_v6 = vsel %vm249_vm9, %v857_v4, -inf }
 0x269   :  { %868 = vmax.xlane.f32.xlu1 %v867_v6 }
 0x2c8   :  { %v472_v8 = vpop.f32.mrb[0].mxu0 }
 0x2c9   :  { %v858_v9 = vmul.f32 0.35355338, %v472_v8  ;;  %v4066_v10 = vpop.f32.mrb[1].mxu0 }
 0x2cb   :  { %v870_v11 = vsel %vm249_vm9, %v858_v9, -inf }
 0x2cc   :  { %v548_v12 = vpop.f32.mrb[6].mxu1  ;;  %871 = vmax.xlane.f32.xlu0 %v870_v11  ;;  %v624_v13 = vpop.f32.mrb[2].mxu0 }
 0x2cd   :  { %v859_v14 = vmul.f32 0.35355338, %v548_v12  ;;  %v860_v15 = vmul.f32 0.35355338, %v624_v13  ;;  %v4071_v16 = vpop.f32.mrb[7].mxu1  ;;  %v4076_v17 = vpop.f32.mrb[3].mxu0 }
 0x2cf   :  { %v873_v18 = vsel %vm249_vm9, %v859_v14, -inf  ;;  %v876_v19 = vsel %vm249_vm9, %v860_v15, -inf }
 0x2d0   :  { %v700_v20 = vpop.f32.mrb[8].mxu1  ;;  %874 = vmax.xlane.f32.xlu0 %v873_v18  ;;  %877 = vmax.xlane.f32.xlu1 %v876_v19  ;;  %v776_v21 = vpop.f32.mrb[4].mxu0 }
 0x2d1   :  { %v861_v22 = vmul.f32 0.35355338, %v700_v20  ;;  %v862_v23 = vmul.f32 0.35355338, %v776_v21  ;;  %v4081_v24 = vpop.f32.mrb[9].mxu1  ;;  %v4086_v25 = vpop.f32.mrb[5].mxu0 }
 0x2d3   :  { %v879_v26 = vsel %vm249_vm9, %v861_v22, -inf  ;;  %v882_v27 = vsel %vm249_vm9, %v862_v23, -inf }
 0x2d4   :  { %v852_v28 = vpop.f32.mrb[10].mxu1  ;;  %880 = vmax.xlane.f32.xlu0 %v879_v26  ;;  %883 = vmax.xlane.f32.xlu1 %v882_v27 }
 0x2d5   :  { %v863_v29 = vmul.f32 0.35355338, %v852_v28  ;;  %v4091_v30 = vpop.f32.mrb[11].mxu1 }
 0x2d7   :  { %v885_v31 = vsel %vm249_vm9, %v863_v29, -inf }
 0x2d8   :  { %886 = vmax.xlane.f32.xlu0 %v885_v31 }
 0x2e5   :  { %952 = vrot.lane.b32.xlu1 %v4647_v46, %s4566_s11 }
 0x2e9   :  { %1104 = vrot.lane.b32.xlu1 %v4674_v49, %s4566_s11 }
 0x2ed   :  { %1180 = vrot.lane.b32.xlu1 %v4680_v51, %s4566_s11 }
 0x2ee   :  { %1028 = vrot.lane.b32.xlu0 %v4658_v47, %s4566_s11 }
 0x2f1   :  { %1332 = vrot.lane.b32.xlu1 %v4678_v50, %s4566_s11 }
 0x2f2   :  { %1256 = vrot.lane.b32.xlu0 %v4672_v48, %s4566_s11  ;;  %v866_v34 = vpop.xlane.xlu0 %865 }
 0x2f3   :  { %v888_v35 = vsub.f32 %v856_v63, %v866_v34 }
 0x2f5   :  { %v896_v37 = vmul.f32 1.442695, %v888_v35 }
 0x2f6   :  { %v869_v32 = vpop.xlane.xlu1 %868 }
 0x2f7   :  { %v889_v33 = vsub.f32 %v857_v4, %v869_v32 }
 0x2f9   :  { %v898_v36 = vmul.f32 1.442695, %v889_v33 }
 0x2fb   :  { %4402 = vpow2.f32 %v898_v36 }
 0x2fc   :  { %4404 = vpow2.f32 %v896_v37 }
 0x305   :  { %v4764_v39 = vpop.eup %4402 }
 0x306   :  { %v915_v40 = vsel %vm249_vm9, %v4764_v39, 0.0  ;;  %v4768_v43 = vpop.eup %4404 }
 0x307   :  { %v912_v45 = vsel %vm249_vm9, %v4768_v43, 0.0 }
 0x311   :  { %916 = vadd.xlane.f32.xlu0 %v915_v40 }
 0x315   :  { %913 = vadd.xlane.f32.xlu1 %v912_v45 }
 0x359   :  { %v872_v46 = vpop.xlane.xlu0 %871 }
 0x35a   :  { %v890_v47 = vsub.f32 %v858_v9, %v872_v46 }
 0x35c   :  { %v900_v48 = vmul.f32 1.442695, %v890_v47 }
 0x35d   :  { %v878_v49 = vpop.xlane.xlu1 %877  ;;  %v875_v50 = vpop.xlane.xlu0 %874 }
 0x35e   :  { %4406 = vpow2.f32 %v900_v48  ;;  %v892_v51 = vsub.f32 %v860_v15, %v878_v49  ;;  %v891_v54 = vsub.f32 %v859_v14, %v875_v50 }
 0x360   :  { %v904_v55 = vmul.f32 1.442695, %v892_v51  ;;  %v902_v56 = vmul.f32 1.442695, %v891_v54 }
 0x361   :  { %v884_v57 = vpop.xlane.xlu1 %883  ;;  %v881_v58 = vpop.xlane.xlu0 %880 }
 0x362   :  { %4408 = vpow2.f32 %v904_v55  ;;  %v894_v59 = vsub.f32 %v862_v23, %v884_v57  ;;  %v893_v60 = vsub.f32 %v861_v22, %v881_v58  ;;  %v45_v57 = vld [vmem:[#allocation5 + $0x30] sm:$0xff] }
 0x363   :  { %4410 = vpow2.f32 %v902_v56  ;;  %v44_v56 = vld [vmem:[#allocation5 + $0x28] sm:$0xff] }
 0x364   :  { %v908_v61 = vmul.f32 1.442695, %v894_v59  ;;  %v906_v62 = vmul.f32 1.442695, %v893_v60  ;;  %v4814_v58 = vpack.c.bf16 %v45_v57, %v44_v56  ;;  %v46_v59 = vld [vmem:[#allocation5 + $0x38] sm:$0xff]  ;;  %v47_v60 = vld [vmem:[#allocation5 + $0x40] sm:$0xff] }
 0x365   :  { %v953_v63 = vpop.permute.xlu1 %952  ;;  %v887_v0 = vpop.xlane.xlu0 %886 }
 0x366   :  { %4412 = vpow2.f32 %v908_v61  ;;  %v895_v1 = vsub.f32 %v863_v29, %v887_v0  ;;  %4093 = vmatpush3.msra.mxu0 %v953_v63  ;;  %v4818_v61 = vpack.c.bf16 %v47_v60, %v46_v59 }
 0x367   :  { %4414 = vpow2.f32 %v906_v62  ;;  %4102 = vmatprep.subr.mxu0 %v4560_v44 }
 0x368   :  { %v4407_v2 = vpop.eup %4406  ;;  %v910_v4 = vmul.f32 1.442695, %v895_v1 }
 0x369   :  { %v1029_v5 = vpop.permute.xlu0 %1028  ;;  %v918_v6 = vsel %vm249_vm9, %v4407_v2, 0.0  ;;  %v1105_v18 = vpop.permute.xlu1 %1104 }
 0x36a   :  { %4416 = vpow2.f32 %v910_v4  ;;  %919 = vadd.xlane.f32.xlu1 %v918_v6  ;;  %4098 = vmatpush3.msra.mxu1 %v1029_v5 }
 0x36b   :  { %4107 = vmatprep.subr.mxu1 %v4560_v44 }
 0x36c   :  { %v4409_v8 = vpop.eup %4408 }
 0x36d   :  { %v4411_v9 = vpop.eup %4410  ;;  %v924_v10 = vsel %vm249_vm9, %v4409_v8, 0.0  ;;  %v1181_v19 = vpop.permute.xlu1 %1180 }
 0x36e   :  { %925 = vadd.xlane.f32.xlu1 %v924_v10  ;;  %v921_v11 = vsel %vm249_vm9, %v4411_v9, 0.0  ;;  %v1257_v20 = vpop.permute.xlu0 %1256 }
 0x36f   :  { %922 = vadd.xlane.f32.xlu0 %v921_v11 }
 0x370   :  { %v4413_v12 = vpop.eup %4412 }
 0x371   :  { %v4415_v13 = vpop.eup %4414  ;;  %v930_v14 = vsel %vm249_vm9, %v4413_v12, 0.0  ;;  %v1333_v21 = vpop.permute.xlu1 %1332 }
 0x372   :  { %931 = vadd.xlane.f32.xlu1 %v930_v14  ;;  %v927_v15 = vsel %vm249_vm9, %v4415_v13, 0.0 }
 0x373   :  { %928 = vadd.xlane.f32.xlu0 %v927_v15 }
 0x374   :  { %v4779_v16 = vpop.eup %4416 }
 0x375   :  { %v933_v17 = vsel %vm249_vm9, %v4779_v16, 0.0 }
 0x377   :  { %934 = vadd.xlane.f32.xlu0 %v933_v17 }
 0x383   :  { %1484 = vrot.lane.b32.xlu1 %v4692_v53, %s4566_s11 }
 0x38d   :  { %1408 = vrot.lane.b32.xlu0 %v4686_v52, %s4566_s11 }
 0x39e   :  { %v917_v22 = vpop.xlane.xlu0 %916 }
 0x39f   :  { %4418 = vrcp.f32 %v917_v22 }
 0x3a2   :  { %v914_v23 = vpop.xlane.xlu1 %913 }
 0x3a3   :  { %4420 = vrcp.f32 %v914_v23 }
 0x3a9   :  { %v4419_v24 = vpop.eup %4418 }
 0x3aa   :  { %v939_v25 = vmul.f32 %v4419_v24, %v4764_v39  ;;  %v4836_v24 = vld [vmem:[#allocation5 + $0x48] ss:$0 sm:$0xff] }
 0x3ac   :  { %4100 = vmatmul.mubr.msk.f32.vlgmr.msra.gmra.mrb[12].mxu1 %vm249_vm9, %v939_v25 }
 0x3ad   :  { %v4421_v26 = vpop.eup %4420  ;;  %4108 = vmatpush3.msra.mxu1 %v1181_v19  ;;  %4109 = vmatprep.mubr.msk.f32.mxu1 %vm4563_vm8, %v4560_v44 }
 0x3ae   :  { %v937_v52 = vmul.f32 %v4421_v26, %v4768_v43  ;;  %4117 = vmatprep.subr.mxu1 %v4560_v44 }
 0x3b0   :  { %4095 = vmatmul.mubr.msk.f32.vlgmr.msra.gmra.mrb[6].mxu0 %vm249_vm9, %v937_v52 }
 0x3b1   :  { %4103 = vmatpush3.msra.mxu0 %v1105_v18  ;;  %4104 = vmatprep.mubr.msk.f32.mxu0 %vm4563_vm8, %v4560_v44 }
 0x3b2   :  { %4112 = vmatprep.subr.mxu0 %v4560_v44 }
 0x3f7   :  { %v920_v53 = vpop.xlane.xlu1 %919 }
 0x3f8   :  { %4422 = vrcp.f32 %v920_v53 }
 0x3fb   :  { %v926_v27 = vpop.xlane.xlu1 %925 }
 0x3fc   :  { %4424 = vrcp.f32 %v926_v27  ;;  %v923_v28 = vpop.xlane.xlu0 %922 }
 0x3fd   :  { %4426 = vrcp.f32 %v923_v28 }
 0x3ff   :  { %v932_v29 = vpop.xlane.xlu1 %931 }
 0x400   :  { %4428 = vrcp.f32 %v932_v29  ;;  %v929_v30 = vpop.xlane.xlu0 %928 }
 0x401   :  { %4430 = vrcp.f32 %v929_v30 }
 0x402   :  { %v4423_v31 = vpop.eup %4422 }
 0x403   :  { %v941_v32 = vmul.f32 %v4423_v31, %v4407_v2  ;;  %v1485_v47 = vpop.permute.xlu1 %1484 }
 0x404   :  { %v935_v33 = vpop.xlane.xlu0 %934 }
 0x405   :  { %4432 = vrcp.f32 %v935_v33  ;;  %4105 = vmatmul.mubr.msk.f32.vlgmr.msra.gmra.mrb[8].mxu0 %vm249_vm9, %v941_v32 }
 0x406   :  { %v4425_v34 = vpop.eup %4424  ;;  %4113 = vmatpush3.msra.mxu0 %v1257_v20  ;;  %4114 = vmatprep.mubr.msk.f32.mxu0 %vm4563_vm8, %v4560_v44 }
 0x407   :  { %v4427_v35 = vpop.eup %4426  ;;  %v945_v36 = vmul.f32 %v4425_v34, %v4409_v8  ;;  %4122 = vmatprep.subr.mxu0 %v4560_v44 }
 0x408   :  { %v943_v37 = vmul.f32 %v4427_v35, %v4411_v9  ;;  %v1409_v39 = vpop.permute.xlu0 %1408  ;;  %v49_v35 = vld [vmem:[#allocation5 + $0x58] sm:$0xff] }
 0x409   :  { %4115 = vmatmul.mubr.msk.f32.vlgmr.msra.gmra.mrb[10].mxu0 %vm249_vm9, %v945_v36  ;;  %v50_v36 = vld [vmem:[#allocation5 + $0x60] sm:$0xff] }
 0x40a   :  { %v4429_v40 = vpop.eup %4428  ;;  %4110 = vmatmul.mubr.msk.f32.vlgmr.msra.gmra.mrb[14].mxu1 %vm249_vm9, %v943_v37  ;;  %4123 = vmatpush3.msra.mxu0 %v1409_v39  ;;  %v51_v37 = vld [vmem:[#allocation5 + $0x68] sm:$0xff] }
 0x40b   :  { %v4431_v43 = vpop.eup %4430  ;;  %v949_v45 = vmul.f32 %v4429_v40, %v4413_v12  ;;  %4118 = vmatpush3.msra.mxu1 %v1333_v21  ;;  %4119 = vmatprep.mubr.msk.f32.mxu1 %vm4563_vm8, %v4560_v44  ;;  %v4855_v39 = vpack.c.bf16 %v51_v37, %v50_v36  ;;  %v52_v40 = vld [vmem:[#allocation5 + $0x78] sm:$0xff] }
 0x40c   :  { %v947_v46 = vmul.f32 %v4431_v43, %v4415_v13  ;;  %4124 = vmatprep.mubr.msk.f32.mxu0 %vm4563_vm8, %v4560_v44  ;;  %4127 = vmatprep.subr.mxu1 %v4560_v44  ;;  %v53_v43 = vld [vmem:[#allocation5 + $0x80] sm:$0xff] }
 0x40d   :  { %4125 = vmatmul.mubr.msk.f32.vlgmr.msra.gmra.mrb[12].mxu0 %vm249_vm9, %v949_v45  ;;  %4314 = vmatprep.subr.bf16.mxu0 %v4814_v58  ;;  %v54_v45 = vld [vmem:[#allocation5 + $0x88] sm:$0xff] }
 0x40e   :  { %4120 = vmatmul.mubr.msk.f32.vlgmr.msra.gmra.mrb[16].mxu1 %vm249_vm9, %v947_v46  ;;  %4316 = vmatpush3.bf16.msra.mxu0 %v4814_v58  ;;  %v4860_v46 = vpack.c.bf16 %v53_v43, %v52_v40 }
 0x40f   :  { %v4433_v48 = vpop.eup %4432  ;;  %4128 = vmatpush3.msra.mxu1 %v1485_v47  ;;  %4129 = vmatprep.mubr.msk.f32.mxu1 %vm4563_vm8, %v4560_v44  ;;  %v55_v47 = vld [vmem:[#allocation5 + $0x90] sm:$0xff] }
 0x410   :  { %v951_v49 = vmul.f32 %v4433_v48, %v4779_v16  ;;  %4318 = vmatprep.subr.bf16.mxu0 %v4818_v61  ;;  %v4862_v48 = vpack.c.bf16 %v55_v47, %v54_v45 }
 0x412   :  { %4130 = vmatmul.mubr.msk.f32.vlgmr.msra.gmra.mrb[18].mxu1 %vm249_vm9, %v951_v49  ;;  %4320 = vmatpush3.bf16.msra.mxu0 %v4818_v61  ;;  %v56_v49 = vld [vmem:[#allocation5 + $0x98] sm:$0xff] }
 0x413   :  { %4330 = vmatprep.subr.bf16.mxu0 %v4860_v46 }
 0x47f   :  { %v1100_v50 = vpop.f32.mrb[12].mxu1 }
 0x480   :  { %v4101_v51 = vpop.f32.mrb[13].mxu1 }
 0x483   :  { %v1024_v54 = vpop.f32.mrb[6].mxu0 }
 0x484   :  { %v4096_v55 = vpop.f32.mrb[7].mxu0 }
 0x4d8   :  { %v1176_v62 = vpop.f32.mrb[8].mxu0 }
 0x4d9   :  { %v4106_v63 = vpop.f32.mrb[9].mxu0  ;;  %1562 = vrot.lane.b32.xlu0 %v1176_v62, %s4559_s5 }
 0x4dc   :  { %v1328_v0 = vpop.f32.mrb[10].mxu0 }
 0x4dd   :  { %v1252_v1 = vpop.f32.mrb[14].mxu1  ;;  %1570 = vrot.lane.b32.xlu0 %v1328_v0, %s4567_s12  ;;  %v4116_v2 = vpop.f32.mrb[11].mxu0 }
 0x4de   :  { %1564 = vrot.lane.b32.xlu1 %v1252_v1, %s4559_s5  ;;  %v4111_v4 = vpop.f32.mrb[15].mxu1 }
 0x4e0   :  { %v1480_v5 = vpop.f32.mrb[12].mxu0 }
 0x4e1   :  { %v1404_v6 = vpop.f32.mrb[16].mxu1  ;;  %1578 = vrot.lane.b32.xlu0 %v1480_v5, %s4568_s13  ;;  %v4126_v8 = vpop.f32.mrb[13].mxu0 }
 0x4e2   :  { %1572 = vrot.lane.b32.xlu1 %v1404_v6, %s4567_s12  ;;  %v4121_v9 = vpop.f32.mrb[17].mxu1 }
 0x4e5   :  { %v1556_v10 = vpop.f32.mrb[18].mxu1 }
 0x4e6   :  { %1580 = vrot.lane.b32.xlu1 %v1556_v10, %s4568_s13  ;;  %v4131_v11 = vpop.f32.mrb[19].mxu1  ;;  %v4872_v10 = vld [vmem:[#allocation5 + $0xc0] ss:$0 sm:$0xff] }
 0x54b   :  { %v1563_v12 = vpop.permute.xlu0 %1562 }
 0x54c   :  { %v1584_v15 = vsel %vm249_vm9, %v1024_v54, %v1563_v12  ;;  %v4874_v12 = vld [vmem:[#allocation5 + $0xc8] ss:$0 sm:$0xff] }
 0x54f   :  { %v1571_v13 = vpop.permute.xlu0 %1570 }
 0x550   :  { %v1565_v14 = vpop.permute.xlu1 %1564  ;;  %v1587_v16 = vsel %vm1586_vm10, %v1584_v15, %v1571_v13 }
 0x551   :  { %v1585_v20 = vsel %vm249_vm9, %v1100_v50, %v1565_v14  ;;  %v57_v50 = vld [vmem:[#allocation5 + $0xa0] sm:$0xff] }
 0x552   :  { %v4867_v51 = vpack.c.bf16 %v57_v50, %v56_v49 }
 0x553   :  { %v1579_v17 = vpop.permute.xlu0 %1578 }
 0x554   :  { %v1573_v18 = vpop.permute.xlu1 %1572  ;;  %v1590_v19 = vsel %vm1589_vm11, %v1587_v16, %v1579_v17 }
 0x555   :  { %4140 = vmatprep.mubr.msk.f32.mxu0 %vm153_vm7, %v1590_v19  ;;  %v1588_v21 = vsel %vm1586_vm10, %v1585_v20, %v1573_v18  ;;  %v58_v20 = vld [vmem:[#allocation5 + $0xa8] sm:$0xff] }
 0x558   :  { %v1581_v22 = vpop.permute.xlu1 %1580 }
 0x559   :  { %v1591_v23 = vsel %vm1589_vm11, %v1588_v21, %v1581_v22  ;;  %v59_v21 = vld [vmem:[#allocation5 + $0xb0] sm:$0xff] }
 0x55a   :  { %4141 = vmatmul.mubr.msk.f32.vlgmr.msra.gmra.mrb[14].mxu0 %vm153_vm7, %v1591_v23  ;;  %v4887_v22 = vpack.c.bf16 %v59_v21, %v58_v20  ;;  %v4892_v23 = vld [vmem:[#allocation5 + $0x70] ss:$0 sm:$0xff] }
 0x55b   :  { %4332 = vmatpush3.bf16.msra.mxu0 %v4860_v46 }
 0x55c   :  { %4334 = vmatprep.subr.bf16.mxu0 %v4862_v48 }
 0x55f   :  { %4336 = vmatpush3.bf16.msra.mxu0 %v4862_v48 }
 0x560   :  { %4338 = vmatprep.subr.bf16.mxu0 %v4867_v51 }
 0x563   :  { %4340 = vmatpush3.bf16.msra.mxu0 %v4867_v51 }
 0x564   :  { %4342 = vmatprep.subr.bf16.mxu0 %v4887_v22 }
 0x567   :  { %4344 = vmatpush3.bf16.msra.mxu0 %v4887_v22 }
 0x568   :  { %4194 = vmatprep.subr.mxu0 %v4560_v44 }
 0x62d   :  { %v4142_v25 = vpop.f32.mrb[14].mxu0 }
 0x62e   :  { %v1670_v26 = vadd.f32 %v4142_v25, %v4836_v24  ;;  %v1664_v52 = vpop.f32.mrb[15].mxu0 }
 0x62f   :  { %v1665_v53 = vadd.f32 %v4836_v24, %v1664_v52 }
 0x630   :  { %v4841_v27 = vadd.f32 %v1670_v26, %v4638_v41  ;;  %v48_v41 = vld [vmem:[#allocation5 + $0x50] sm:$0xff] }
 0x631   :  { %v1673_v28 = vadd.f32 %v1665_v53, %v4632_v38  ;;  %v4851_v38 = vpack.c.bf16 %v49_v35, %v48_v41 }
 0x632   :  { %v1678_v29 = vsel %vm153_vm7, %v4841_v27, 0.0  ;;  %v1685_v33 = vmul.f32 %v4841_v27, %v4841_v27 }
 0x633   :  { %1679 = vadd.xlane.f32.xlu1 %v1678_v29  ;;  %v1675_v30 = vsel %vm153_vm7, %v1673_v28, 0.0  ;;  %v1684_v31 = vmul.f32 %v1673_v28, %v1673_v28  ;;  %4322 = vmatprep.subr.bf16.mxu1 %v4851_v38 }
 0x634   :  { %1676 = vadd.xlane.f32.xlu0 %v1675_v30  ;;  %v1689_v34 = vsel %vm153_vm7, %v1685_v33, 0.0  ;;  %4324 = vmatpush3.bf16.msra.mxu1 %v4851_v38 }
 0x635   :  { %v1686_v32 = vsel %vm153_vm7, %v1684_v31, 0.0  ;;  %4326 = vmatprep.subr.bf16.mxu1 %v4855_v39 }
 0x638   :  { %1687 = vadd.xlane.f32.xlu0 %v1686_v32  ;;  %4328 = vmatpush3.bf16.msra.mxu1 %v4855_v39 }
 0x639   :  { %4346 = vmatprep.subr.bf16.mxu1 %v4614_v3 }
 0x63c   :  { %1690 = vadd.xlane.f32.xlu0 %v1689_v34 }
 0x6c0   :  { %v1680_v56 = vpop.xlane.xlu1 %1679 }
 0x6c1   :  { %v1677_v54 = vpop.xlane.xlu0 %1676  ;;  %v1683_v59 = vmul.f32 0.03125, %v1680_v56 }
 0x6c2   :  { %v1682_v55 = vmul.f32 0.03125, %v1677_v54 }
 0x6c3   :  { %v1695_v1 = vmul.f32 %v1683_v59, %v1683_v59  ;;  %v1699_v13 = vsub.f32 %v4841_v27, %v1683_v59  ;;  %v4900_v27 = vld [vmem:[#allocation5 + $0xb8] ss:$0 sm:$0xff] }
 0x6c4   :  { %v1694_v60 = vmul.f32 %v1682_v55, %v1682_v55  ;;  %v1698_v8 = vsub.f32 %v1673_v28, %v1682_v55 }
 0x6c5   :  { %v1688_v57 = vpop.xlane.xlu0 %1687 }
 0x6c6   :  { %v1692_v62 = vmul.f32 0.03125, %v1688_v57 }
 0x6c8   :  { %v1696_v63 = vsub.f32 %v1692_v62, %v1694_v60 }
 0x6c9   :  { %v1691_v0 = vpop.xlane.xlu0 %1690 }
 0x6ca   :  { %v1700_v2 = vadd.f32 1e-05, %v1696_v63  ;;  %v1693_v4 = vmul.f32 0.03125, %v1691_v0 }
 0x6cc   :  { %4434 = vrsqrt.f32 %v1700_v2  ;;  %v1697_v5 = vsub.f32 %v1693_v4, %v1695_v1 }
 0x6ce   :  { %v1701_v6 = vadd.f32 1e-05, %v1697_v5  ;;  %v4908_v5 = vld [vmem:[#allocation5 + $0xd0] ss:$0 sm:$0xff] }
 0x6d0   :  { %4436 = vrsqrt.f32 %v1701_v6 }
 0x6d6   :  { %v4435_v9 = vpop.eup %4434 }
 0x6d7   :  { %v1704_v11 = vmul.f32 %v4435_v9, %v1698_v8 }
 0x6d9   :  { %v1706_v14 = vmul.f32 %v4872_v10, %v1704_v11  ;;  %v4910_v11 = vld [vmem:[#allocation5 + $0xd8] ss:$0 sm:$0xff] }
 0x6da   :  { %v4437_v15 = vpop.eup %4436 }
 0x6db   :  { %v1705_v16 = vmul.f32 %v4437_v15, %v1699_v13  ;;  %v1708_v17 = vadd.f32 %v4874_v12, %v1706_v14 }
 0x6dd   :  { %4151 = vmatprep.mubr.msk.f32.mxu1 %vm153_vm7, %v1708_v17  ;;  %v1707_v18 = vmul.f32 %v4872_v10, %v1705_v16 }
 0x6df   :  { %v1709_v19 = vadd.f32 %v4874_v12, %v1707_v18 }
 0x6e1   :  { %4152 = vmatmul.mubr.msk.f32.vlgmr.msra.gmra.mrb[20].mxu1 %vm153_vm7, %v1709_v19 }
 0x6e2   :  { %4348 = vmatpush3.bf16.msra.mxu1 %v4614_v3 }
 0x6e3   :  { %4350 = vmatprep.subr.bf16.mxu1 %v4616_v7 }
 0x6e6   :  { %4352 = vmatpush3.bf16.msra.mxu1 %v4616_v7 }
 0x6e7   :  { %4184 = vmatprep.subr.mxu1 %v4560_v44 }
 0x7b4   :  { %v4153_v25 = vpop.f32.mrb[20].mxu1 }
 0x7b5   :  { %v1788_v3 = vadd.f32 %v4153_v25, %v4892_v23  ;;  %v1782_v26 = vpop.f32.mrb[21].mxu1 }
 0x7b6   :  { %v1783_v7 = vadd.f32 %v4892_v23, %v1782_v26 }
 0x7b7   :  { %v1792_v53 = vmax.f32 %v1788_v3, 0.0 }
 0x7b8   :  { %v1791_v52 = vmax.f32 %v1783_v7, 0.0 }
 0x7ba   :  { %4170 = vmatprep.mubr.msk.f32.mxu0 %vm1793_vm12, %v1791_v52 }
 0x7bb   :  { %4171 = vmatmul.mubr.msk.f32.vlgmr.msra.gmra.mrb[16].mxu0 %vm1793_vm12, %v1792_v53 }
 0x7bc   :  { %4196 = vmatprep.mubr.msk.f32.mxu0 %vm4563_vm8, %v4560_v44 }
 0x88e   :  { %v4172_v28 = vpop.f32.mrb[16].mxu0 }
 0x88f   :  { %v1872_v29 = vadd.f32 %v4172_v28, %v4900_v27  ;;  %v1866_v30 = vpop.f32.mrb[17].mxu0 }
 0x890   :  { %v1867_v31 = vadd.f32 %v4900_v27, %v1866_v30 }
 0x891   :  { %v1876_v32 = vadd.f32 %v1872_v29, %v1709_v19 }
 0x892   :  { %v1875_v33 = vadd.f32 %v1867_v31, %v1708_v17 }
 0x893   :  { %v1880_v34 = vsel %vm153_vm7, %v1876_v32, 0.0  ;;  %v1886_v41 = vmul.f32 %v1876_v32, %v1876_v32 }
 0x894   :  { %1881 = vadd.xlane.f32.xlu0 %v1880_v34  ;;  %v1877_v35 = vsel %vm153_vm7, %v1875_v33, 0.0  ;;  %v1885_v36 = vmul.f32 %v1875_v33, %v1875_v33 }
 0x895   :  { %1878 = vadd.xlane.f32.xlu1 %v1877_v35  ;;  %v1890_v37 = vsel %vm153_vm7, %v1886_v41, 0.0 }
 0x896   :  { %v1887_v40 = vsel %vm153_vm7, %v1885_v36, 0.0 }
 0x898   :  { %1891 = vadd.xlane.f32.xlu0 %v1890_v37 }
 0x899   :  { %1888 = vadd.xlane.f32.xlu1 %v1887_v40 }
 0x921   :  { %v1882_v43 = vpop.xlane.xlu0 %1881 }
 0x922   :  { %v1884_v45 = vmul.f32 0.03125, %v1882_v43  ;;  %v1879_v47 = vpop.xlane.xlu1 %1878 }
 0x923   :  { %v1883_v49 = vmul.f32 0.03125, %v1879_v47 }
 0x924   :  { %v1896_v54 = vmul.f32 %v1884_v45, %v1884_v45  ;;  %v1900_v1 = vsub.f32 %v1876_v32, %v1884_v45 }
 0x925   :  { %v1892_v50 = vpop.xlane.xlu0 %1891  ;;  %v1895_v57 = vmul.f32 %v1883_v49, %v1883_v49  ;;  %v1899_v4 = vsub.f32 %v1875_v33, %v1883_v49 }
 0x926   :  { %v1894_v55 = vmul.f32 0.03125, %v1892_v50  ;;  %v1889_v56 = vpop.xlane.xlu1 %1888 }
 0x927   :  { %v1893_v59 = vmul.f32 0.03125, %v1889_v56 }
 0x928   :  { %v1898_v60 = vsub.f32 %v1894_v55, %v1896_v54 }
 0x929   :  { %v1897_v62 = vsub.f32 %v1893_v59, %v1895_v57 }
 0x92a   :  { %v1902_v63 = vadd.f32 1e-05, %v1898_v60 }
 0x92b   :  { %v1901_v0 = vadd.f32 1e-05, %v1897_v62 }
 0x92c   :  { %4438 = vrsqrt.f32 %v1902_v63 }
 0x92d   :  { %4440 = vrsqrt.f32 %v1901_v0 }
 0x936   :  { %v4439_v2 = vpop.eup %4438 }
 0x937   :  { %v4441_v6 = vpop.eup %4440  ;;  %v1906_v8 = vmul.f32 %v4439_v2, %v1900_v1 }
 0x938   :  { %v1905_v9 = vmul.f32 %v4441_v6, %v1899_v4 }
 0x939   :  { %v1908_v13 = vmul.f32 %v4908_v5, %v1906_v8 }
 0x93a   :  { %v1907_v14 = vmul.f32 %v4908_v5, %v1905_v9 }
 0x93b   :  { %v4918_v16 = vadd.f32 %v4910_v11, %v1908_v13 }
 0x93c   :  { %v4915_v15 = vadd.f32 %v4910_v11, %v1907_v14 }
 0x93e   :  { %4181 = vmatprep.mubr.msk.f32.mxu1 %vm153_vm7, %v4915_v15 }
 0x93f   :  { %4182 = vmatmul.mubr.msk.f32.vlgmr.msra.gmra.mrb[22].mxu1 %vm153_vm7, %v4918_v16 }
 0x940   :  { %4186 = vmatprep.mubr.msk.f32.mxu1 %vm4563_vm8, %v4560_v44 }
 0xa12   :  { %v4183_v17 = vpop.f32.mrb[22].mxu1 }
 0xa13   :  { %v4927_v18 = vadd.f32 %v4183_v17, %v4642_v42  ;;  %v1983_v19 = vpop.f32.mrb[23].mxu1 }
 0xa14   :  { %v4930_v20 = vadd.f32 %v4642_v42, %v1983_v19 }
 0xa15   :  { %1996 = vrot.lane.b32.xlu0 %v4927_v18, %s4562_s8 }
 0xa16   :  { %1994 = vrot.lane.b32.xlu1 %v4930_v20, %s4562_s8 }
 0xa19   :  { %2002 = vrot.lane.b32.xlu0 %v4930_v20, %s4564_s9 }
 0xa1a   :  { %1998 = vrot.lane.b32.xlu1 %v4930_v20, %s4561_s1 }
 0xa1d   :  { %2006 = vrot.lane.b32.xlu0 %v4930_v20, %s4565_s10 }
 0xa1e   :  { %2000 = vrot.lane.b32.xlu1 %v4927_v18, %s4561_s1 }
 0xa22   :  { %2004 = vrot.lane.b32.xlu1 %v4927_v18, %s4564_s9 }
 0xa26   :  { %2082 = vrot.lane.b32.xlu1 %v4927_v18, %s4565_s10 }
 0xa87   :  { %v4948_v42 = vpop.permute.xlu0 %1996 }
 0xa88   :  { %2234 = vrot.lane.b32.xlu1 %v4948_v42, %s4565_s10  ;;  %v4952_v21 = vpop.permute.xlu1 %1994 }
 0xa89   :  { %2158 = vrot.lane.b32.xlu0 %v4952_v21, %s4565_s10 }
 0xa8b   :  { %v4956_v25 = vpop.permute.xlu0 %2002 }
 0xa8c   :  { %v4958_v3 = vpop.permute.xlu1 %1998 }
 0xa8d   :  { %2310 = vrot.lane.b32.xlu0 %v4958_v3, %s4565_s10 }
 0xa8f   :  { %v2007_v26 = vpop.permute.xlu0 %2006 }
 0xa90   :  { %4185 = vmatpush3.xpose.msk.msra.mxu1 %vm249_vm9, %v2007_v26  ;;  %v4963_v7 = vpop.permute.xlu1 %2000 }
 0xa91   :  { %2462 = vrot.lane.b32.xlu0 %v4956_v25, %s4565_s10  ;;  %2386 = vrot.lane.b32.xlu1 %v4963_v7, %s4565_s10 }
 0xa92   :  { %4189 = vmatprep.subr.mxu1 %v4560_v44 }
 0xa93   :  { %4187 = vmatmul.mubr.msk.f32.vlgmr.msra.gmra.mrb[24].mxu1 %vm249_vm9, %v4930_v20 }
 0xa94   :  { %v4972_v52 = vpop.permute.xlu1 %2004  ;;  %4191 = vmatprep.mubr.msk.f32.mxu1 %vm4563_vm8, %v4560_v44 }
 0xa95   :  { %2538 = vrot.lane.b32.xlu1 %v4972_v52, %s4565_s10 }
 0xa98   :  { %v2083_v53 = vpop.permute.xlu1 %2082 }
 0xa99   :  { %4190 = vmatpush3.xpose.msk.msra.mxu1 %vm249_vm9, %v2083_v53 }
 0xa9a   :  { %4199 = vmatprep.subr.mxu1 %v4560_v44 }
 0xa9c   :  { %4192 = vmatmul.mubr.msk.f32.vlgmr.msra.gmra.mrb[26].mxu1 %vm249_vm9, %v4927_v18 }
 0xa9d   :  { %4201 = vmatprep.mubr.msk.f32.mxu1 %vm4563_vm8, %v4560_v44 }
 0xafa   :  { %v2235_v28 = vpop.permute.xlu1 %2234 }
 0xafb   :  { %v2159_v29 = vpop.permute.xlu0 %2158  ;;  %4200 = vmatpush3.xpose.msk.msra.mxu1 %vm249_vm9, %v2235_v28 }
 0xafc   :  { %4195 = vmatpush3.xpose.msk.msra.mxu0 %vm249_vm9, %v2159_v29  ;;  %4209 = vmatprep.subr.mxu1 %v4560_v44 }
 0xafd   :  { %4204 = vmatprep.subr.mxu0 %v4560_v44 }
 0xafe   :  { %4202 = vmatmul.mubr.msk.f32.vlgmr.msra.gmra.mrb[28].mxu1 %vm249_vm9, %v4948_v42 }
 0xaff   :  { %4197 = vmatmul.mubr.msk.f32.vlgmr.msra.gmra.mrb[18].mxu0 %vm249_vm9, %v4952_v21  ;;  %v2311_v30 = vpop.permute.xlu0 %2310  ;;  %4211 = vmatprep.mubr.msk.f32.mxu1 %vm4563_vm8, %v4560_v44 }
 0xb00   :  { %4205 = vmatpush3.xpose.msk.msra.mxu0 %vm249_vm9, %v2311_v30  ;;  %4206 = vmatprep.mubr.msk.f32.mxu0 %vm4563_vm8, %v4560_v44 }
 0xb01   :  { %4214 = vmatprep.subr.mxu0 %v4560_v44 }
 0xb03   :  { %4207 = vmatmul.mubr.msk.f32.vlgmr.msra.gmra.mrb[20].mxu0 %vm249_vm9, %v4958_v3  ;;  %v2463_v31 = vpop.permute.xlu0 %2462  ;;  %v2387_v32 = vpop.permute.xlu1 %2386 }
 0xb04   :  { %4210 = vmatpush3.xpose.msk.msra.mxu1 %vm249_vm9, %v2387_v32  ;;  %4215 = vmatpush3.xpose.msk.msra.mxu0 %vm249_vm9, %v2463_v31 }
 0xb05   :  { %4216 = vmatprep.mubr.msk.f32.mxu0 %vm4563_vm8, %v4560_v44  ;;  %4219 = vmatprep.subr.mxu1 %v4560_v44 }
 0xb06   :  { %4224 = vmatprep.subr.mxu0 %v4560_v44 }
 0xb07   :  { %4212 = vmatmul.mubr.msk.f32.vlgmr.msra.gmra.mrb[30].mxu1 %vm249_vm9, %v4963_v7  ;;  %4217 = vmatmul.mubr.msk.f32.vlgmr.msra.gmra.mrb[22].mxu0 %vm249_vm9, %v4956_v25  ;;  %v2539_v33 = vpop.permute.xlu1 %2538 }
 0xb08   :  { %4220 = vmatpush3.xpose.msk.msra.mxu1 %vm249_vm9, %v2539_v33  ;;  %4221 = vmatprep.mubr.msk.f32.mxu1 %vm4563_vm8, %v4560_v44 }
 0xb09   :  { %4229 = vmatprep.subr.mxu1 %v4560_v44  ;;  %4226 = vmatprep.mubr.msk.f32.mxu0 %vm4563_vm8, %v4560_v44 }
 0xb0b   :  { %4222 = vmatmul.mubr.msk.f32.vlgmr.msra.gmra.mrb[32].mxu1 %vm249_vm9, %v4972_v52 }
 0xb0c   :  { %4231 = vmatprep.mubr.msk.f32.mxu1 %vm4563_vm8, %v4560_v44 }
 0xb66   :  { %v2078_v34 = vpop.f32.mrb[24].mxu1 }
 0xb67   :  { %v2614_v41 = vmul.f32 0.35355338, %v2078_v34  ;;  %v4188_v35 = vpop.f32.mrb[25].mxu1 }
 0xb69   :  { %v2622_v36 = vsel %vm249_vm9, %v2614_v41, -inf }
 0xb6a   :  { %2623 = vmax.xlane.f32.xlu0 %v2622_v36 }
 0xb6f   :  { %v2154_v37 = vpop.f32.mrb[26].mxu1 }
 0xb70   :  { %v2615_v40 = vmul.f32 0.35355338, %v2154_v37  ;;  %v4193_v43 = vpop.f32.mrb[27].mxu1 }
 0xb72   :  { %v2625_v45 = vsel %vm249_vm9, %v2615_v40, -inf }
 0xb73   :  { %2626 = vmax.xlane.f32.xlu1 %v2625_v45 }
 0xbd1   :  { %v2306_v47 = vpop.f32.mrb[28].mxu1 }
 0xbd2   :  { %v2230_v49 = vpop.f32.mrb[18].mxu0  ;;  %v4203_v50 = vpop.f32.mrb[29].mxu1  ;;  %v2617_v56 = vmul.f32 0.35355338, %v2306_v47 }
 0xbd3   :  { %v2616_v54 = vmul.f32 0.35355338, %v2230_v49  ;;  %v4198_v55 = vpop.f32.mrb[19].mxu0 }
 0xbd4   :  { %v2631_v0 = vsel %vm249_vm9, %v2617_v56, -inf }
 0xbd5   :  { %v2628_v57 = vsel %vm249_vm9, %v2616_v54, -inf }
 0xbd6   :  { %2629 = vmax.xlane.f32.xlu0 %v2628_v57  ;;  %v2382_v59 = vpop.f32.mrb[20].mxu0 }
 0xbd7   :  { %v2618_v60 = vmul.f32 0.35355338, %v2382_v59  ;;  %v4208_v62 = vpop.f32.mrb[21].mxu0 }
 0xbd9   :  { %v2634_v63 = vsel %vm249_vm9, %v2618_v60, -inf }
 0xbda   :  { %v2534_v1 = vpop.f32.mrb[22].mxu0  ;;  %2635 = vmax.xlane.f32.xlu1 %v2634_v63  ;;  %2632 = vmax.xlane.f32.xlu0 %v2631_v0  ;;  %v2458_v2 = vpop.f32.mrb[30].mxu1 }
 0xbdb   :  { %v2620_v4 = vmul.f32 0.35355338, %v2534_v1  ;;  %v2619_v6 = vmul.f32 0.35355338, %v2458_v2  ;;  %v4213_v8 = vpop.f32.mrb[31].mxu1  ;;  %v4218_v9 = vpop.f32.mrb[23].mxu0 }
 0xbdd   :  { %v2640_v13 = vsel %vm249_vm9, %v2620_v4, -inf  ;;  %v2637_v14 = vsel %vm249_vm9, %v2619_v6, -inf }
 0xbde   :  { %2641 = vmax.xlane.f32.xlu1 %v2640_v13  ;;  %2638 = vmax.xlane.f32.xlu0 %v2637_v14  ;;  %v2610_v17 = vpop.f32.mrb[32].mxu1 }
 0xbdf   :  { %v2621_v19 = vmul.f32 0.35355338, %v2610_v17  ;;  %v4223_v26 = vpop.f32.mrb[33].mxu1 }
 0xbe1   :  { %v2643_v53 = vsel %vm249_vm9, %v2621_v19, -inf }
 0xbe2   :  { %2644 = vmax.xlane.f32.xlu0 %v2643_v53 }
 0xbef   :  { %2710 = vrot.lane.b32.xlu1 %v4930_v20, %s4566_s11 }
 0xbf3   :  { %2862 = vrot.lane.b32.xlu1 %v4952_v21, %s4566_s11 }
 0xbf7   :  { %2938 = vrot.lane.b32.xlu1 %v4948_v42, %s4566_s11  ;;  %v2624_v30 = vpop.xlane.xlu0 %2623 }
 0xbf8   :  { %2786 = vrot.lane.b32.xlu0 %v4927_v18, %s4566_s11  ;;  %v2646_v31 = vsub.f32 %v2614_v41, %v2624_v30 }
 0xbfa   :  { %v2654_v32 = vmul.f32 1.442695, %v2646_v31 }
 0xbfb   :  { %3090 = vrot.lane.b32.xlu1 %v4963_v7, %s4566_s11 }
 0xbfc   :  { %3014 = vrot.lane.b32.xlu0 %v4958_v3, %s4566_s11 }
 0xc00   :  { %v2627_v28 = vpop.xlane.xlu1 %2626 }
 0xc01   :  { %v2647_v29 = vsub.f32 %v2615_v40, %v2627_v28 }
 0xc03   :  { %v2656_v20 = vmul.f32 1.442695, %v2647_v29 }
 0xc05   :  { %4442 = vpow2.f32 %v2656_v20 }
 0xc06   :  { %4444 = vpow2.f32 %v2654_v32 }
 0xc0f   :  { %v5040_v21 = vpop.eup %4442 }
 0xc10   :  { %v2673_v42 = vsel %vm249_vm9, %v5040_v21, 0.0  ;;  %v5044_v18 = vpop.eup %4444 }
 0xc11   :  { %v2670_v7 = vsel %vm249_vm9, %v5044_v18, 0.0 }
 0xc1b   :  { %2674 = vadd.xlane.f32.xlu0 %v2673_v42 }
 0xc1f   :  { %2671 = vadd.xlane.f32.xlu1 %v2670_v7 }
 0xc63   :  { %v2630_v3 = vpop.xlane.xlu0 %2629 }
 0xc64   :  { %v2648_v33 = vsub.f32 %v2616_v54, %v2630_v3 }
 0xc66   :  { %v2658_v34 = vmul.f32 1.442695, %v2648_v33 }
 0xc67   :  { %v2633_v41 = vpop.xlane.xlu0 %2632  ;;  %v2636_v35 = vpop.xlane.xlu1 %2635 }
 0xc68   :  { %4446 = vpow2.f32 %v2658_v34  ;;  %v2649_v36 = vsub.f32 %v2617_v56, %v2633_v41  ;;  %v2650_v37 = vsub.f32 %v2618_v60, %v2636_v35 }
 0xc6a   :  { %v2660_v40 = vmul.f32 1.442695, %v2649_v36  ;;  %v2662_v43 = vmul.f32 1.442695, %v2650_v37 }
 0xc6b   :  { %v2639_v45 = vpop.xlane.xlu0 %2638  ;;  %v2642_v47 = vpop.xlane.xlu1 %2641 }
 0xc6c   :  { %4448 = vpow2.f32 %v2660_v40  ;;  %v2651_v49 = vsub.f32 %v2619_v6, %v2639_v45  ;;  %v2652_v50 = vsub.f32 %v2620_v4, %v2642_v47 }
 0xc6d   :  { %4450 = vpow2.f32 %v2662_v43 }
 0xc6e   :  { %v2664_v55 = vmul.f32 1.442695, %v2651_v49  ;;  %v2666_v57 = vmul.f32 1.442695, %v2652_v50 }
 0xc6f   :  { %v2645_v59 = vpop.xlane.xlu0 %2644  ;;  %v2711_v62 = vpop.permute.xlu1 %2710 }
 0xc70   :  { %4452 = vpow2.f32 %v2664_v55  ;;  %v2653_v54 = vsub.f32 %v2621_v19, %v2645_v59  ;;  %4225 = vmatpush3.msra.mxu0 %v2711_v62 }
 0xc71   :  { %4454 = vpow2.f32 %v2666_v57  ;;  %4234 = vmatprep.subr.mxu0 %v4560_v44 }
 0xc72   :  { %v4447_v56 = vpop.eup %4446  ;;  %v2668_v60 = vmul.f32 1.442695, %v2653_v54 }
 0xc73   :  { %v2787_v63 = vpop.permute.xlu0 %2786  ;;  %v2676_v0 = vsel %vm249_vm9, %v4447_v56, 0.0  ;;  %v2863_v26 = vpop.permute.xlu1 %2862 }
 0xc74   :  { %4456 = vpow2.f32 %v2668_v60  ;;  %2677 = vadd.xlane.f32.xlu1 %v2676_v0  ;;  %4230 = vmatpush3.msra.mxu1 %v2787_v63 }
 0xc75   :  { %4239 = vmatprep.subr.mxu1 %v4560_v44 }
 0xc76   :  { %v4449_v1 = vpop.eup %4448 }
 0xc77   :  { %v4451_v2 = vpop.eup %4450  ;;  %v2679_v4 = vsel %vm249_vm9, %v4449_v1, 0.0  ;;  %v2939_v53 = vpop.permute.xlu1 %2938 }
 0xc78   :  { %2680 = vadd.xlane.f32.xlu0 %v2679_v4  ;;  %v2682_v6 = vsel %vm249_vm9, %v4451_v2, 0.0  ;;  %v3015_v28 = vpop.permute.xlu0 %3014 }
 0xc79   :  { %2683 = vadd.xlane.f32.xlu1 %v2682_v6 }
 0xc7a   :  { %v4453_v8 = vpop.eup %4452 }
 0xc7b   :  { %v4455_v9 = vpop.eup %4454  ;;  %v2685_v13 = vsel %vm249_vm9, %v4453_v8, 0.0  ;;  %v3091_v29 = vpop.permute.xlu1 %3090 }
 0xc7c   :  { %2686 = vadd.xlane.f32.xlu0 %v2685_v13  ;;  %v2688_v14 = vsel %vm249_vm9, %v4455_v9, 0.0 }
 0xc7d   :  { %2689 = vadd.xlane.f32.xlu1 %v2688_v14 }
 0xc7e   :  { %v5055_v17 = vpop.eup %4456 }
 0xc7f   :  { %v2691_v19 = vsel %vm249_vm9, %v5055_v17, 0.0 }
 0xc80   :  { %2692 = vadd.xlane.f32.xlu0 %v2691_v19 }
 0xc8e   :  { %3242 = vrot.lane.b32.xlu1 %v4972_v52, %s4566_s11 }
 0xc96   :  { %3166 = vrot.lane.b32.xlu0 %v4956_v25, %s4566_s11 }
 0xca8   :  { %v2675_v30 = vpop.xlane.xlu0 %2674 }
 0xca9   :  { %4458 = vrcp.f32 %v2675_v30 }
 0xcac   :  { %v2672_v31 = vpop.xlane.xlu1 %2671 }
 0xcad   :  { %4460 = vrcp.f32 %v2672_v31 }
 0xcb3   :  { %v4459_v20 = vpop.eup %4458 }
 0xcb4   :  { %v2697_v32 = vmul.f32 %v4459_v20, %v5040_v21 }
 0xcb6   :  { %4232 = vmatmul.mubr.msk.f32.vlgmr.msra.gmra.mrb[34].mxu1 %vm249_vm9, %v2697_v32 }
 0xcb7   :  { %v4461_v42 = vpop.eup %4460  ;;  %4240 = vmatpush3.msra.mxu1 %v2939_v53  ;;  %4241 = vmatprep.mubr.msk.f32.mxu1 %vm4563_vm8, %v4560_v44 }
 0xcb8   :  { %v2695_v25 = vmul.f32 %v4461_v42, %v5044_v18  ;;  %4249 = vmatprep.subr.mxu1 %v4560_v44 }
 0xcba   :  { %4227 = vmatmul.mubr.msk.f32.vlgmr.msra.gmra.mrb[24].mxu0 %vm249_vm9, %v2695_v25 }
 0xcbb   :  { %4235 = vmatpush3.msra.mxu0 %v2863_v26  ;;  %4236 = vmatprep.mubr.msk.f32.mxu0 %vm4563_vm8, %v4560_v44 }
 0xcbc   :  { %4244 = vmatprep.subr.mxu0 %v4560_v44 }
 0xd01   :  { %v2678_v52 = vpop.xlane.xlu1 %2677 }
 0xd02   :  { %4462 = vrcp.f32 %v2678_v52 }
 0xd05   :  { %v2681_v21 = vpop.xlane.xlu0 %2680 }
 0xd06   :  { %4464 = vrcp.f32 %v2681_v21  ;;  %v2684_v7 = vpop.xlane.xlu1 %2683 }
 0xd07   :  { %4466 = vrcp.f32 %v2684_v7 }
 0xd09   :  { %v2687_v3 = vpop.xlane.xlu0 %2686 }
 0xd0a   :  { %4468 = vrcp.f32 %v2687_v3  ;;  %v2690_v33 = vpop.xlane.xlu1 %2689 }
 0xd0b   :  { %4470 = vrcp.f32 %v2690_v33 }
 0xd0c   :  { %v4463_v18 = vpop.eup %4462 }
 0xd0d   :  { %v2699_v34 = vmul.f32 %v4463_v18, %v4447_v56  ;;  %v2693_v41 = vpop.xlane.xlu0 %2692 }
 0xd0e   :  { %4472 = vrcp.f32 %v2693_v41  ;;  %v3243_v55 = vpop.permute.xlu1 %3242 }
 0xd0f   :  { %4237 = vmatmul.mubr.msk.f32.vlgmr.msra.gmra.mrb[26].mxu0 %vm249_vm9, %v2699_v34 }
 0xd10   :  { %v4465_v35 = vpop.eup %4464  ;;  %4245 = vmatpush3.msra.mxu0 %v3015_v28  ;;  %4246 = vmatprep.mubr.msk.f32.mxu0 %vm4563_vm8, %v4560_v44 }
 0xd11   :  { %v4467_v36 = vpop.eup %4466  ;;  %v2701_v37 = vmul.f32 %v4465_v35, %v4449_v1  ;;  %4254 = vmatprep.subr.mxu0 %v4560_v44  ;;  %v3167_v43 = vpop.permute.xlu0 %3166 }
 0xd12   :  { %v2703_v40 = vmul.f32 %v4467_v36, %v4451_v2 }
 0xd13   :  { %4242 = vmatmul.mubr.msk.f32.vlgmr.msra.gmra.mrb[36].mxu1 %vm249_vm9, %v2701_v37 }
 0xd14   :  { %v4469_v45 = vpop.eup %4468  ;;  %4247 = vmatmul.mubr.msk.f32.vlgmr.msra.gmra.mrb[28].mxu0 %vm249_vm9, %v2703_v40  ;;  %4250 = vmatpush3.msra.mxu1 %v3091_v29 }
 0xd15   :  { %v4471_v47 = vpop.eup %4470  ;;  %v2705_v49 = vmul.f32 %v4469_v45, %v4453_v8  ;;  %4255 = vmatpush3.msra.mxu0 %v3167_v43  ;;  %4251 = vmatprep.mubr.msk.f32.mxu1 %vm4563_vm8, %v4560_v44 }
 0xd16   :  { %v2707_v50 = vmul.f32 %v4471_v47, %v4455_v9  ;;  %4256 = vmatprep.mubr.msk.f32.mxu0 %vm4563_vm8, %v4560_v44  ;;  %4259 = vmatprep.subr.mxu1 %v4560_v44 }
 0xd17   :  { %4252 = vmatmul.mubr.msk.f32.vlgmr.msra.gmra.mrb[38].mxu1 %vm249_vm9, %v2705_v49  ;;  %4354 = vmatprep.subr.bf16.mxu0 %v4814_v58 }
 0xd18   :  { %v4473_v57 = vpop.eup %4472  ;;  %4257 = vmatmul.mubr.msk.f32.vlgmr.msra.gmra.mrb[30].mxu0 %vm249_vm9, %v2707_v50  ;;  %4260 = vmatpush3.msra.mxu1 %v3243_v55 }
 0xd19   :  { %v2709_v59 = vmul.f32 %v4473_v57, %v5055_v17  ;;  %4261 = vmatprep.mubr.msk.f32.mxu1 %vm4563_vm8, %v4560_v44  ;;  %4356 = vmatpush3.bf16.msra.mxu0 %v4814_v58 }
 0xd1a   :  { %4358 = vmatprep.subr.bf16.mxu0 %v4818_v61  ;;  %4362 = vmatprep.subr.bf16.mxu1 %v4851_v38 }
 0xd1b   :  { %4262 = vmatmul.mubr.msk.f32.vlgmr.msra.gmra.mrb[40].mxu1 %vm249_vm9, %v2709_v59 }
 0xd1c   :  { %4364 = vmatpush3.bf16.msra.mxu1 %v4851_v38 }
 0xd1d   :  { %4360 = vmatpush3.bf16.msra.mxu0 %v4818_v61  ;;  %4366 = vmatprep.subr.bf16.mxu1 %v4855_v39 }
 0xd1e   :  { %4370 = vmatprep.subr.bf16.mxu0 %v4860_v46 }
 0xd20   :  { %4368 = vmatpush3.bf16.msra.mxu1 %v4855_v39 }
 0xd89   :  { %v2858_v62 = vpop.f32.mrb[34].mxu1 }
 0xd8a   :  { %v4233_v44 = vpop.f32.mrb[35].mxu1 }
 0xd8d   :  { %v2782_v54 = vpop.f32.mrb[24].mxu0 }
 0xd8e   :  { %v4228_v58 = vpop.f32.mrb[25].mxu0 }
 0xde2   :  { %v2934_v56 = vpop.f32.mrb[26].mxu0 }
 0xde3   :  { %3320 = vrot.lane.b32.xlu0 %v2934_v56, %s4559_s5  ;;  %v4238_v60 = vpop.f32.mrb[27].mxu0 }
 0xde6   :  { %v3010_v63 = vpop.f32.mrb[36].mxu1 }
 0xde7   :  { %v3086_v0 = vpop.f32.mrb[28].mxu0  ;;  %3322 = vrot.lane.b32.xlu1 %v3010_v63, %s4559_s5  ;;  %v4243_v38 = vpop.f32.mrb[37].mxu1 }
 0xde8   :  { %3328 = vrot.lane.b32.xlu0 %v3086_v0, %s4567_s12  ;;  %v4248_v61 = vpop.f32.mrb[29].mxu0 }
 0xdea   :  { %v3162_v1 = vpop.f32.mrb[38].mxu1 }
 0xdeb   :  { %v3238_v2 = vpop.f32.mrb[30].mxu0  ;;  %3330 = vrot.lane.b32.xlu1 %v3162_v1, %s4567_s12  ;;  %v4253_v39 = vpop.f32.mrb[39].mxu1 }
 0xdec   :  { %3336 = vrot.lane.b32.xlu0 %v3238_v2, %s4568_s13  ;;  %v4258_v4 = vpop.f32.mrb[31].mxu0 }
 0xdee   :  { %v3314_v6 = vpop.f32.mrb[40].mxu1 }
 0xdef   :  { %3338 = vrot.lane.b32.xlu1 %v3314_v6, %s4568_s13  ;;  %v4263_v8 = vpop.f32.mrb[41].mxu1 }
 0xe55   :  { %v3321_v9 = vpop.permute.xlu0 %3320 }
 0xe56   :  { %v3342_v17 = vsel %vm249_vm9, %v2782_v54, %v3321_v9 }
 0xe59   :  { %v3323_v13 = vpop.permute.xlu1 %3322 }
 0xe5a   :  { %v3329_v14 = vpop.permute.xlu0 %3328  ;;  %v3343_v29 = vsel %vm249_vm9, %v2858_v62, %v3323_v13 }
 0xe5b   :  { %v3344_v26 = vsel %vm1586_vm10, %v3342_v17, %v3329_v14 }
 0xe5d   :  { %v3331_v19 = vpop.permute.xlu1 %3330 }
 0xe5e   :  { %v3337_v53 = vpop.permute.xlu0 %3336  ;;  %v3345_v30 = vsel %vm1586_vm10, %v3343_v29, %v3331_v19 }
 0xe5f   :  { %v3346_v28 = vsel %vm1589_vm11, %v3344_v26, %v3337_v53 }
 0xe60   :  { %4272 = vmatprep.mubr.msk.f32.mxu0 %vm153_vm7, %v3346_v28 }
 0xe61   :  { %v3339_v31 = vpop.permute.xlu1 %3338 }
 0xe62   :  { %v3347_v20 = vsel %vm1589_vm11, %v3345_v30, %v3339_v31 }
 0xe63   :  { %4273 = vmatmul.mubr.msk.f32.vlgmr.msra.gmra.mrb[32].mxu0 %vm153_vm7, %v3347_v20 }
 0xe64   :  { %4372 = vmatpush3.bf16.msra.mxu0 %v4860_v46 }
 0xe65   :  { %4374 = vmatprep.subr.bf16.mxu0 %v4862_v48 }
 0xe68   :  { %4376 = vmatpush3.bf16.msra.mxu0 %v4862_v48 }
 0xe69   :  { %4378 = vmatprep.subr.bf16.mxu0 %v4867_v51 }
 0xe6c   :  { %4380 = vmatpush3.bf16.msra.mxu0 %v4867_v51 }
 0xe6d   :  { %4382 = vmatprep.subr.bf16.mxu0 %v4887_v22 }
 0xe70   :  { %4384 = vmatpush3.bf16.msra.mxu0 %v4887_v22 }
 0xf36   :  { %v4274_v32 = vpop.f32.mrb[32].mxu0 }
 0xf37   :  { %v3426_v42 = vadd.f32 %v4274_v32, %v4836_v24  ;;  %v3420_v25 = vpop.f32.mrb[33].mxu0 }
 0xf38   :  { %v3421_v52 = vadd.f32 %v4836_v24, %v3420_v25 }
 0xf39   :  { %v3430_v46 = vadd.f32 %v3426_v42, %v4918_v16 }
 0xf3a   :  { %v3429_v21 = vadd.f32 %v3421_v52, %v4915_v15 }
 0xf3b   :  { %v3434_v48 = vsel %vm153_vm7, %v3430_v46, 0.0  ;;  %v3440_v22 = vmul.f32 %v3430_v46, %v3430_v46 }
 0xf3c   :  { %3435 = vadd.xlane.f32.xlu1 %v3434_v48  ;;  %v3431_v7 = vsel %vm153_vm7, %v3429_v21, 0.0  ;;  %v3439_v51 = vmul.f32 %v3429_v21, %v3429_v21  ;;  %v4569_v48 = vmov 1966171168  }
 0xf3d   :  { %3432 = vadd.xlane.f32.xlu0 %v3431_v7  ;;  %v3444_v33 = vsel %vm153_vm7, %v3440_v22, 0.0  ;;  %v3668_v7 = vunpack.c.l.s4 %v4569_v48 }
 0xf3e   :  { %v3441_v3 = vsel %vm153_vm7, %v3439_v51, 0.0  ;;  %v3670_v51 = vlaneseq }
 0xf3f   :  { %v3669_v22 = vunpack.c.0.s8 %v3668_v7 }
 0xf41   :  { %3442 = vadd.xlane.f32.xlu0 %v3441_v3 }
 0xf45   :  { %3445 = vadd.xlane.f32.xlu0 %v3444_v33  ;;  %v3671_v33 = vshrl.u32 %v3670_v51, 7 }
 0xfc9   :  { %v3436_v34 = vpop.xlane.xlu1 %3435 }
 0xfca   :  { %v3433_v18 = vpop.xlane.xlu0 %3432  ;;  %v3438_v41 = vmul.f32 0.03125, %v3436_v34 }
 0xfcb   :  { %v3437_v24 = vmul.f32 0.03125, %v3433_v18 }
 0xfcc   :  { %v3450_v40 = vmul.f32 %v3438_v41, %v3438_v41  ;;  %v3454_v59 = vsub.f32 %v3430_v46, %v3438_v41 }
 0xfcd   :  { %v3449_v15 = vmul.f32 %v3437_v24, %v3437_v24  ;;  %v3453_v50 = vsub.f32 %v3429_v21, %v3437_v24 }
 0xfce   :  { %v3443_v16 = vpop.xlane.xlu0 %3442 }
 0xfcf   :  { %v3447_v35 = vmul.f32 0.03125, %v3443_v16 }
 0xfd1   :  { %v3451_v36 = vsub.f32 %v3447_v35, %v3449_v15  ;;  %v3672_v15 = vsub.s32 %v3669_v22, %v3671_v33 }
 0xfd2   :  { %v3446_v37 = vpop.xlane.xlu0 %3445 }
 0xfd3   :  { %v3455_v43 = vadd.f32 1e-05, %v3451_v36  ;;  %v3448_v45 = vmul.f32 0.03125, %v3446_v37 }
 0xfd5   :  { %4474 = vrsqrt.f32 %v3455_v43  ;;  %v3452_v47 = vsub.f32 %v3448_v45, %v3450_v40 }
 0xfd7   :  { %v3456_v49 = vadd.f32 1e-05, %v3452_v47  ;;  %v3775_v47 = vsub.s32 0, %v3671_v33 }
 0xfd9   :  { %4476 = vrsqrt.f32 %v3456_v49 }
 0xfdf   :  { %v4475_v55 = vpop.eup %4474 }
 0xfe0   :  { %v3459_v57 = vmul.f32 %v4475_v55, %v3453_v50 }
 0xfe2   :  { %v3461_v62 = vmul.f32 %v4872_v10, %v3459_v57 }
 0xfe3   :  { %v4477_v44 = vpop.eup %4476 }
 0xfe4   :  { %v3460_v54 = vmul.f32 %v4477_v44, %v3454_v59  ;;  %v3463_v58 = vadd.f32 %v4874_v12, %v3461_v62 }
 0xfe6   :  { %4283 = vmatprep.mubr.msk.f32.mxu1 %vm153_vm7, %v3463_v58  ;;  %v3462_v56 = vmul.f32 %v4872_v10, %v3460_v54 }
 0xfe8   :  { %v3464_v60 = vadd.f32 %v4874_v12, %v3462_v56 }
 0xfea   :  { %4284 = vmatmul.mubr.msk.f32.vlgmr.msra.gmra.mrb[42].mxu1 %vm153_vm7, %v3464_v60 }
0x10bd   :  { %v4285_v63 = vpop.f32.mrb[42].mxu1 }
0x10be   :  { %v3543_v0 = vadd.f32 %v4285_v63, %v4892_v23  ;;  %v3537_v38 = vpop.f32.mrb[43].mxu1 }
0x10bf   :  { %v3538_v61 = vadd.f32 %v4892_v23, %v3537_v38 }
0x10c0   :  { %v3547_v2 = vmax.f32 %v3543_v0, 0.0 }
0x10c1   :  { %v3546_v1 = vmax.f32 %v3538_v61, 0.0 }
0x10c3   :  { %4302 = vmatprep.mubr.msk.f32.mxu0 %vm1793_vm12, %v3546_v1 }
0x10c4   :  { %4303 = vmatmul.mubr.msk.f32.vlgmr.msra.gmra.mrb[34].mxu0 %vm1793_vm12, %v3547_v2 }
0x1197   :  { %v4304_v39 = vpop.f32.mrb[34].mxu0 }
0x1198   :  { %v3626_v4 = vadd.f32 %v4304_v39, %v4900_v27  ;;  %v3620_v10 = vpop.f32.mrb[35].mxu0 }
0x1199   :  { %v3621_v12 = vadd.f32 %v4900_v27, %v3620_v10 }
0x119a   :  { %v3630_v6 = vadd.f32 %v3626_v4, %v3464_v60 }
0x119b   :  { %v3629_v8 = vadd.f32 %v3621_v12, %v3463_v58 }
0x119c   :  { %v3634_v9 = vsel %vm153_vm7, %v3630_v6, 0.0  ;;  %v3640_v13 = vmul.f32 %v3630_v6, %v3630_v6 }
0x119d   :  { %3635 = vadd.xlane.f32.xlu1 %v3634_v9  ;;  %v3631_v23 = vsel %vm153_vm7, %v3629_v8, 0.0  ;;  %v3639_v14 = vmul.f32 %v3629_v8, %v3629_v8 }
0x119e   :  { %3632 = vadd.xlane.f32.xlu0 %v3631_v23  ;;  %v3644_v17 = vsel %vm153_vm7, %v3640_v13, 0.0 }
0x119f   :  { %v3641_v19 = vsel %vm153_vm7, %v3639_v14, 0.0 }
0x11a1   :  { %3645 = vadd.xlane.f32.xlu1 %v3644_v17 }
0x11a2   :  { %3642 = vadd.xlane.f32.xlu0 %v3641_v19 }
0x122a   :  { %v3636_v26 = vpop.xlane.xlu1 %3635 }
0x122b   :  { %v3638_v53 = vmul.f32 0.03125, %v3636_v26  ;;  %v3633_v28 = vpop.xlane.xlu0 %3632 }
0x122c   :  { %v3637_v27 = vmul.f32 0.03125, %v3633_v28 }
0x122d   :  { %v3650_v30 = vmul.f32 %v3638_v53, %v3638_v53  ;;  %v3654_v3 = vsub.f32 %v3630_v6, %v3638_v53 }
0x122e   :  { %v3646_v29 = vpop.xlane.xlu1 %3645  ;;  %v3649_v32 = vmul.f32 %v3637_v27, %v3637_v27  ;;  %v3653_v24 = vsub.f32 %v3629_v8, %v3637_v27 }
0x122f   :  { %v3648_v31 = vmul.f32 0.03125, %v3646_v29  ;;  %v3643_v20 = vpop.xlane.xlu0 %3642 }
0x1230   :  { %v3647_v42 = vmul.f32 0.03125, %v3643_v20 }
0x1231   :  { %v3652_v25 = vsub.f32 %v3648_v31, %v3650_v30 }
0x1232   :  { %v3651_v52 = vsub.f32 %v3647_v42, %v3649_v32 }
0x1233   :  { %v3656_v46 = vadd.f32 1e-05, %v3652_v25 }
0x1234   :  { %v3655_v21 = vadd.f32 1e-05, %v3651_v52 }
0x1235   :  { %4478 = vrsqrt.f32 %v3656_v46 }
0x1236   :  { %4480 = vrsqrt.f32 %v3655_v21 }
0x123f   :  { %v4479_v18 = vpop.eup %4478 }
0x1240   :  { %v4481_v34 = vpop.eup %4480  ;;  %v3660_v16 = vmul.f32 %v4479_v18, %v3654_v3 }
0x1241   :  { %v3659_v41 = vmul.f32 %v4481_v34, %v3653_v24 }
0x1242   :  { %v3662_v35 = vmul.f32 %v4908_v5, %v3660_v16 }
0x1243   :  { %v3661_v36 = vmul.f32 %v4908_v5, %v3659_v41 }
0x1244   :  { %v3664_v37 = vadd.f32 %v4910_v11, %v3662_v35 }
0x1245   :  { %v3663_v40 = vadd.f32 %v4910_v11, %v3661_v36 }
0x1246   :  { %v3724_v43 = vcombine.high %v3664_v37, %v3664_v37  ;;  %v3731_v45 = vrot.slane %v3664_v37, %v3672_v15 }
0x1247   :  { %v3666_v49 = vcombine.high %v3663_v40, %v3663_v40  ;;  %v3673_v50 = vrot.slane %v3663_v40, %v3672_v15 }
0x1248   :  { %v3738_v55 = vrot.slane %v3724_v43, %v3672_v15  ;;  %v3739_v57 = vcombine.high %v3731_v45, %v3731_v45  ;;  %v3747_v59 = vrot.slane %v3731_v45, %v3672_v15 }
0x1249   :  { %v3680_v62 = vrot.slane %v3666_v49, %v3672_v15  ;;  %v3681_v44 = vcombine.high %v3673_v50, %v3673_v50  ;;  %v3689_v54 = vrot.slane %v3673_v50, %v3672_v15 }
0x124a   :  { %v3740_v58 = vcombine.high %v3738_v55, %v3738_v55  ;;  %v3754_v56 = vrot.slane %v3738_v55, %v3672_v15  ;;  %v3761_v5 = vrot.slane %v3739_v57, %v3672_v15  ;;  %v3769_v60 = vcombine.high %v3747_v59, %v3747_v59 }
0x124b   :  { %v3776_v63 = vrot.slane %v3747_v59, %v3775_v47  ;;  %v3682_v0 = vcombine.high %v3680_v62, %v3680_v62  ;;  %v3696_v11 = vrot.slane %v3680_v62, %v3672_v15  ;;  %v3703_v38 = vrot.slane %v3681_v44, %v3672_v15 }
0x124c   :  { %v3768_v61 = vrot.slane %v3740_v58, %v3672_v15  ;;  %v3770_v1 = vcombine.high %v3754_v56, %v3754_v56  ;;  %v3771_v2 = vcombine.high %v3761_v5, %v3761_v5  ;;  %v3780_v39 = vrot.slane %v3761_v5, %v3775_v47 }
0x124d   :  { %v3784_v4 = vrot.slane %v3769_v60, %v3775_v47  ;;  %v3792_v10 = vrot.slane %v3754_v56, %v3775_v47  ;;  %v3710_v12 = vrot.slane %v3682_v0, %v3672_v15  ;;  %v3711_v6 = vcombine.high %v3689_v54, %v3689_v54 }
0x124e   :  { %v3772_v8 = vcombine.high %v3768_v61, %v3768_v61  ;;  %v3788_v9 = vrot.slane %v3771_v2, %v3775_v47  ;;  %v3796_v13 = vrot.slane %v3768_v61, %v3775_v47  ;;  %v3800_v23 = vrot.slane %v3770_v1, %v3775_v47 }
0x124f   :  { %v3712_v14 = vcombine.high %v3696_v11, %v3696_v11  ;;  %v3713_v17 = vcombine.high %v3703_v38, %v3703_v38  ;;  %v3714_v19 = vcombine.high %v3710_v12, %v3710_v12  ;;  %v3814_v26 = vsel %vm3813_vm13, %v3689_v54, %v3776_v63 }
0x1250   :  { %v3804_v53 = vrot.slane %v3772_v8, %v3775_v47  ;;  %v3815_v28 = vsel %vm3813_vm13, %v3703_v38, %v3780_v39  ;;  %v3816_v27 = vsel %vm3813_vm13, %v3711_v6, %v3784_v4  ;;  %v3818_v29 = vsel %vm3813_vm13, %v3696_v11, %v3792_v10  ;;  %3823 = vst.msk [vmem:[#allocation7] sm:$0x3] %vm3822_vm14, %v3814_v26 }
0x1251   :  { %v3817_v30 = vsel %vm3813_vm13, %v3713_v17, %v3788_v9  ;;  %v3819_v31 = vsel %vm3813_vm13, %v3710_v12, %v3796_v13  ;;  %v3820_v20 = vsel %vm3813_vm13, %v3712_v14, %v3800_v23  ;;  %3824 = vst.msk [vmem:[#allocation7 + $0x2] sm:$0x3] %vm3822_vm14, %v3815_v28  ;;  %3825 = vst.msk [vmem:[#allocation7 + $0x4] sm:$0x3] %vm3822_vm14, %v3816_v27 }
0x1252   :  { %3827 = vst.msk [vmem:[#allocation7 + $0x8] sm:$0x3] %vm3822_vm14, %v3818_v29  ;;  %v3821_v32 = vsel %vm3813_vm13, %v3714_v19, %v3804_v53  ;;  %3826 = vst.msk [vmem:[#allocation7 + $0x6] sm:$0x3] %vm3822_vm14, %v3817_v30 }
0x1253   :  { %3828 = vst.msk [vmem:[#allocation7 + $0xa] sm:$0x3] %vm3822_vm14, %v3819_v31  ;;  %3829 = vst.msk [vmem:[#allocation7 + $0xc] sm:$0x3] %vm3822_vm14, %v3820_v20 }
0x1254   :  { %3830 = vst.msk [vmem:[#allocation7 + $0xe] sm:$0x3] %vm3822_vm14, %v3821_v32 }
0x1255   :  { %4537 = shalt.err (!%p4534_p6)
}
0x1256   :  { %s4538_s21 = scalar_lea.hbm %s5181_s2, 256 }
0x1257   :  { %p4539_p7 = scmp.ne.s32.totalorder %s5181_s2, %s4538_s21  ;;  %p4542_p8 = scmp.lt.u32.totalorder %s4538_s21, %s5181_s2 }
0x1259   :  { %p4544_p9 = pnand %p4542_p8, %p4539_p7 }
0x125b   :  { %4547 = shalt.err (!%p4544_p9)
}
0x125c   :  { %3842 = dma.vmem_to_hbm [thread:$0]  %s3837_s15, 256, %s5181_s2, [#allocation4], %s4555_s19, %s4555_s19, %s4556_s20  }
0x125d   :  { %4552 = dma.done.wait [#allocation4], 256  }
0x125e   :  { %4553 = vsyncadd [#allocation4], 4294967040 }
0x125f   :  { %3846 = vsyncpa [#allocation3], 1 }
0x1260   :  { %3847 = vsyncpa [#allocation6], 1 }
0x1261   :  { %3848 = vsyncpa [#allocation4], 1 }

</bundles_post_ra>
